<compile_context>
chip_gen: v5e
topology: v5e:2x2
jax: 0.10.0
libtpu: 0.0.40
codegen_flags: <defaults>
</compile_context>

<pallas_src>
import jax
import jax.numpy as jnp
from jax import lax
from jax.experimental import pallas as pl
from jax.experimental.pallas import tpu as pltpu

# --- hyper-parameters fixed by TextCNN.__init__ -----------------------------
EMB_DIM = 100
KERNELS = (3, 4, 5)
KERNEL_NUMBER = (150, 150, 150)
HIDDEN = 50

# --- "globals" the module pulls from its surrounding script -----------------
MAX_LEN = 8          # sequence length == Conv1d in_channels
VOC_SIZE = 200       # stand-in for len(tokenizer.vocab)
N_CLASS = 7
BATCH = 2

# --- derived layout constants ------------------------------------------------
MAX_K = max(KERNELS)                 # 5 : shared pad / im2col window
KC = MAX_K * MAX_LEN                 # 40 : shared contraction rows
N_CONV = sum(KERNEL_NUMBER)          # 450 : fused conv output features
N_PAD = 512                          # conv features padded to lane-dense width
T_PAD = 112                          # pooled row extent (multiple of 8, >= 106)
L_FRAME = T_PAD + MAX_K - 1          # 116 : padded conv length frame
OUT_PAD = 128                        # lane-dense hidden / logits width
NEG = -1e30                          # additive "-inf" row mask

# slab512 row layout (all boundaries multiples of 8)
ROW_W0, ROW_W1 = 0, KC               # fused conv weights (40, 512)
ROW_M0, ROW_M1 = KC, KC + T_PAD      # -inf row mask      (112, 512)
ROW_CB = ROW_M1                      # conv bias row
ROW_LB = ROW_M1 + 1                  # hidden-linear bias row (lanes 0:128 used)
ROW_OB = ROW_M1 + 2                  # output bias row        (lanes 0:128 used)
S512_ROWS = 160

# slab128 row layout
S128_LW0, S128_LW1 = 0, N_PAD                  # hidden weights (512, 128)
S128_OW0, S128_OW1 = N_PAD, N_PAD + OUT_PAD    # output weights (128, 128)
S128_ROWS = N_PAD + OUT_PAD                    # 640


def textcnn_kernel(a_ref, s512_ref, s128_ref, o_ref):
    bb = o_ref.shape[0]                                   # batch elems this step
    w      = s512_ref[ROW_W0:ROW_W1, :]                   # (40, 512)
    mask   = s512_ref[ROW_M0:ROW_M1, :]                   # (112, 512)
    conv_b = s512_ref[ROW_CB:ROW_CB + 1, :]               # (1, 512)
    lin_b  = s512_ref[ROW_LB:ROW_LB + 1, 0:OUT_PAD]       # (1, 128)
    out_b  = s512_ref[ROW_OB:ROW_OB + 1, 0:OUT_PAD]       # (1, 128)
    lw     = s128_ref[S128_LW0:S128_LW1, :]               # (512, 128)
    ow     = s128_ref[S128_OW0:S128_OW1, :]               # (128, 128)

    # ONE fused conv matmul for all three branches and all bb batch elements.
    y = jnp.dot(a_ref[...], w, preferred_element_type=jnp.float32)  # (bb*112, 512)

    # Per-element max-pool over masked 112-row segments (8-aligned static slices).
    pooled = []
    for i in range(bb):                                   # static loop, bb <= 8
        seg = y[i * T_PAD:(i + 1) * T_PAD, :]             # (112, 512)
        pooled.append(jnp.max(seg + mask, axis=0, keepdims=True))
    pooled = jnp.concatenate(pooled, axis=0)              # (bb, 512)

    # bias + ReLU AFTER the pool: relu(max(z) + b) == max(relu(z + b)).
    # Dropout(0.1) is identity at inference; the post-concat F.relu is a no-op.
    act = jnp.maximum(pooled + conv_b, 0.0)               # (bb, 512)
    h = jnp.dot(act, lw, preferred_element_type=jnp.float32) + lin_b        # (bb, 128)
    o_ref[...] = jnp.dot(h, ow, preferred_element_type=jnp.float32) + out_b  # (bb, 128)


def prepare_params(params):
    """One-time re-layout of the PyTorch-style params into two packed slabs."""
    def pad_w(w, k):
        shift = MAX_K - k                      # align branch-k window to pad-5 frame
        wp = jnp.zeros((w.shape[0], MAX_LEN, MAX_K), jnp.float32)
        wp = wp.at[:, :, shift:shift + k].set(w)
        # flatten to (j*C + c, O) to match the im2col column order
        return jnp.transpose(wp, (2, 1, 0)).reshape(KC, w.shape[0])

    w_fused = jnp.concatenate(
        [pad_w(params['w3'], 3), pad_w(params['w4'], 4), pad_w(params['w5'], 5)],
        axis=1)                                                        # (40, 450)
    w_fused = jnp.pad(w_fused, ((0, 0), (0, N_PAD - N_CONV)))          # (40, 512)

    # -inf mask for rows beyond each branch's true l_out (and padded columns).
    mask = jnp.full((T_PAD, N_PAD), NEG, jnp.float32)
    col = 0
    for k, kn in zip(KERNELS, KERNEL_NUMBER):
        l_out = EMB_DIM + k + 1                           # PyTorch Conv1d L_out
        mask = mask.at[:l_out, col:col + kn].set(0.0)
        col += kn

    conv_b = jnp.pad(jnp.concatenate([params['b3'], params['b4'], params['b5']]),
                     (0, N_PAD - N_CONV))
    lin_b = jnp.pad(params['lin_b'], (0, N_PAD - HIDDEN))
    out_b = jnp.pad(params['out_b'], (0, N_PAD - N_CLASS))

    slab512 = jnp.zeros((S512_ROWS, N_PAD), jnp.float32)
    slab512 = slab512.at[ROW_W0:ROW_W1, :].set(w_fused)
    slab512 = slab512.at[ROW_M0:ROW_M1, :].set(mask)
    slab512 = slab512.at[ROW_CB, :].set(conv_b)
    slab512 = slab512.at[ROW_LB, :].set(lin_b)
    slab512 = slab512.at[ROW_OB, :].set(out_b)

    lw = jnp.zeros((N_PAD, OUT_PAD), jnp.float32).at[:N_CONV, :HIDDEN].set(
        params['lin_w'].T)
    ow = jnp.zeros((OUT_PAD, OUT_PAD), jnp.float32).at[:HIDDEN, :N_CLASS].set(
        params['out_w'].T)
    slab128 = jnp.concatenate([lw, ow], axis=0)                        # (640, 128)

    return {'emb': params['emb'], 'slab512': slab512, 'slab128': slab128}


@jax.jit
def textcnn_forward(token_ids, prepped):
    emb, slab512, slab128 = prepped['emb'], prepped['slab512'], prepped['slab128']
    B = token_ids.shape[0]

    # TODO(synk): embedding gather stays as XLA glue fused into this jit; an
    # in-kernel SMEM-token gather buys nothing at these tiny sizes.
    x = emb[token_ids]                                     # (B, C=MAX_LEN, L=EMB_DIM)

    # Shared im2col in the wrapper (fused with the gather / pad): pad-5 frame,
    # 5 shifted slices stacked along lanes -> (B, 112, 40); batch folded into M.
    xp = jnp.pad(x, ((0, 0), (0, 0), (MAX_K, L_FRAME - MAX_K - EMB_DIM)))  # (B,8,116)
    xt = jnp.transpose(xp, (0, 2, 1))                                       # (B,116,8)
    cols = jnp.stack([xt[:, j:j + T_PAD, :] for j in range(MAX_K)], axis=2)  # (B,112,5,8)
    a = cols.reshape(B, T_PAD, KC)

    bb = B if B <= 8 else 8                 # batch elements per grid step
    nb = pl.cdiv(B, bb)
    b_pad = nb * bb
    if b_pad != B:
        a = jnp.pad(a, ((0, b_pad - B), (0, 0), (0, 0)))
    a = a.reshape(b_pad * T_PAD, KC)

    out = pl.pallas_call(
        textcnn_kernel,
        out_shape=jax.ShapeDtypeStruct((b_pad, OUT_PAD), jnp.float32),
        grid=(nb,),
        in_specs=[
            pl.BlockSpec((bb * T_PAD, KC), lambda b: (b, 0)),
            pl.BlockSpec((S512_ROWS, N_PAD), lambda b: (0, 0)),
            pl.BlockSpec((S128_ROWS, OUT_PAD), lambda b: (0, 0)),
        ],
        out_specs=pl.BlockSpec((bb, OUT_PAD), lambda b: (b, 0)),
        compiler_params=pltpu.CompilerParams(
            dimension_semantics=("parallel",)),
    )(a, slab512, slab128)
    return out[:B, :N_CLASS]


def reference_forward(token_ids, params):
    """Independent pure-JAX reference (lax conv) mirroring the PyTorch forward."""
    x = params['emb'][token_ids]                            # (B, MAX_LEN, EMB_DIM)
    feats = []
    for k, w, b in ((3, params['w3'], params['b3']),
                    (4, params['w4'], params['b4']),
                    (5, params['w5'], params['b5'])):
        y = lax.conv_general_dilated(x, w, window_strides=(1,), padding=[(k, k)],
                                     dimension_numbers=('NCH', 'OIH', 'NCH'))
        y = jnp.maximum(y + b[None, :, None], 0.0)
        feats.append(jnp.max(y, axis=2))
    feat = jnp.concatenate(feats, axis=1)
    feat = jnp.maximum(feat, 0.0)
    h = feat @ params['lin_w'].T + params['lin_b']
    return h @ params['out_w'].T + params['out_b']


if __name__ == "__main__":
    key = jax.random.PRNGKey(0)
    ks = jax.random.split(key, 12)
    params = {
        'emb':   jax.random.normal(ks[0], (VOC_SIZE, EMB_DIM), jnp.float32) * 0.1,
        'w3':    jax.random.normal(ks[1], (KERNEL_NUMBER[0], MAX_LEN, 3), jnp.float32) * 0.1,
        'b3':    jax.random.normal(ks[2], (KERNEL_NUMBER[0],), jnp.float32) * 0.1,
        'w4':    jax.random.normal(ks[3], (KERNEL_NUMBER[1], MAX_LEN, 4), jnp.float32) * 0.1,
        'b4':    jax.random.normal(ks[4], (KERNEL_NUMBER[1],), jnp.float32) * 0.1,
        'w5':    jax.random.normal(ks[5], (KERNEL_NUMBER[2], MAX_LEN, 5), jnp.float32) * 0.1,
        'b5':    jax.random.normal(ks[6], (KERNEL_NUMBER[2],), jnp.float32) * 0.1,
        'lin_w': jax.random.normal(ks[7], (HIDDEN, sum(KERNEL_NUMBER)), jnp.float32) * 0.05,
        'lin_b': jax.random.normal(ks[8], (HIDDEN,), jnp.float32) * 0.05,
        'out_w': jax.random.normal(ks[9], (N_CLASS, HIDDEN), jnp.float32) * 0.05,
        'out_b': jax.random.normal(ks[10], (N_CLASS,), jnp.float32) * 0.05,
    }
    token_ids = jax.random.randint(ks[11], (BATCH, MAX_LEN), 0, VOC_SIZE, dtype=jnp.int32)

    # One-time parameter re-layout (hoisted out of the per-call forward).
    prepped = jax.tree_util.tree_map(jax.block_until_ready, prepare_params(params))

    out = jax.block_until_ready(textcnn_forward(token_ids, prepped))
    ref = reference_forward(token_ids, params)

    assert out.shape == (BATCH, N_CLASS), out.shape
    assert jnp.allclose(out, ref, atol=1e-3, rtol=1e-3), (out, ref)
    print("KERNEL_OK")
</pallas_src>

<mosaic_0001>
module attributes {stable_mosaic.version = 11 : i64} {
  func.func @textcnn_kernel(%arg0: i32, %arg1: memref<224x40xf32, #tpu.memory_space<vmem>>, %arg2: memref<160x512xf32, #tpu.memory_space<vmem>>, %arg3: memref<640x128xf32, #tpu.memory_space<vmem>>, %arg4: memref<2x128xf32, #tpu.memory_space<vmem>>) attributes {dimension_semantics = [#tpu.dimension_semantics<parallel>], iteration_bounds = array<i64: 1>, scalar_prefetch = 0 : i64, scratch_operands = 0 : i64, tpu.core_type = #tpu.core_type<tc>, window_params = [{transform_indices = @transform_0, window_bounds = array<i64: 224, 40>}, {pipeline_mode = #tpu.pipeline_mode<synchronous>, transform_indices = @transform_1, window_bounds = array<i64: 160, 512>}, {pipeline_mode = #tpu.pipeline_mode<synchronous>, transform_indices = @transform_2, window_bounds = array<i64: 640, 128>}, {transform_indices = @transform_3, window_bounds = array<i64: 2, 128>}]} {
    %c0 = arith.constant 0 : index
    %c0_0 = arith.constant 0 : index
    %0 = vector.load %arg2[%c0, %c0_0] : memref<160x512xf32, #tpu.memory_space<vmem>>, vector<40x512xf32>
    %c40 = arith.constant 40 : index
    %c0_1 = arith.constant 0 : index
    %1 = vector.load %arg2[%c40, %c0_1] : memref<160x512xf32, #tpu.memory_space<vmem>>, vector<112x512xf32>
    %c152 = arith.constant 152 : index
    %c0_2 = arith.constant 0 : index
    %2 = vector.load %arg2[%c152, %c0_2] : memref<160x512xf32, #tpu.memory_space<vmem>>, vector<1x512xf32>
    %c153 = arith.constant 153 : index
    %c0_3 = arith.constant 0 : index
    %3 = vector.load %arg2[%c153, %c0_3] : memref<160x512xf32, #tpu.memory_space<vmem>>, vector<1x128xf32>
    %c154 = arith.constant 154 : index
    %c0_4 = arith.constant 0 : index
    %4 = vector.load %arg2[%c154, %c0_4] : memref<160x512xf32, #tpu.memory_space<vmem>>, vector<1x128xf32>
    %c0_5 = arith.constant 0 : index
    %c0_6 = arith.constant 0 : index
    %5 = vector.load %arg3[%c0_5, %c0_6] : memref<640x128xf32, #tpu.memory_space<vmem>>, vector<512x128xf32>
    %c512 = arith.constant 512 : index
    %c0_7 = arith.constant 0 : index
    %6 = vector.load %arg3[%c512, %c0_7] : memref<640x128xf32, #tpu.memory_space<vmem>>, vector<128x128xf32>
    %c0_8 = arith.constant 0 : index
    %c0_9 = arith.constant 0 : index
    %7 = vector.load %arg1[%c0_8, %c0_9] : memref<224x40xf32, #tpu.memory_space<vmem>>, vector<224x40xf32>
    %cst = arith.constant dense<0.000000e+00> : vector<224x512xf32>
    %8 = tpu.matmul %7, %0, %cst {dimension_numbers = #tpu.dot_dimension_numbers<[1], [0], [0], [1], [0, 0, 1, 1], [], []>} : vector<224x40xf32>, vector<40x512xf32>, vector<224x512xf32> -> vector<224x512xf32>
    %9 = vector.extract_strided_slice %8 {offsets = [0, 0], sizes = [112, 512], strides = [1, 1]} : vector<224x512xf32> to vector<112x512xf32>
    %10 = arith.addf %9, %1 : vector<112x512xf32>
    %cst_10 = arith.constant dense<0xFF800000> : vector<512xf32>
    %11 = vector.multi_reduction <maximumf>, %10, %cst_10 [0] : vector<112x512xf32> to vector<512xf32>
    %12 = vector.shape_cast %11 : vector<512xf32> to vector<1x512xf32>
    %13 = vector.extract_strided_slice %8 {offsets = [112, 0], sizes = [112, 512], strides = [1, 1]} : vector<224x512xf32> to vector<112x512xf32>
    %14 = arith.addf %13, %1 : vector<112x512xf32>
    %cst_11 = arith.constant dense<0xFF800000> : vector<512xf32>
    %15 = vector.multi_reduction <maximumf>, %14, %cst_11 [0] : vector<112x512xf32> to vector<512xf32>
    %16 = vector.shape_cast %15 : vector<512xf32> to vector<1x512xf32>
    %17 = tpu.concatenate %12, %16 in 0 : vector<1x512xf32>, vector<1x512xf32> -> vector<2x512xf32>
    %18 = vector.broadcast %2 : vector<1x512xf32> to vector<2x512xf32>
    %19 = arith.addf %17, %18 : vector<2x512xf32>
    %cst_12 = arith.constant 0.000000e+00 : f32
    %20 = vector.broadcast %cst_12 : f32 to vector<2x512xf32>
    %21 = arith.maximumf %19, %20 : vector<2x512xf32>
    %cst_13 = arith.constant dense<0.000000e+00> : vector<2x128xf32>
    %22 = tpu.matmul %21, %5, %cst_13 {dimension_numbers = #tpu.dot_dimension_numbers<[1], [0], [0], [1], [0, 0, 1, 1], [], []>} : vector<2x512xf32>, vector<512x128xf32>, vector<2x128xf32> -> vector<2x128xf32>
    %23 = vector.broadcast %3 : vector<1x128xf32> to vector<2x128xf32>
    %24 = arith.addf %22, %23 : vector<2x128xf32>
    %cst_14 = arith.constant dense<0.000000e+00> : vector<2x128xf32>
    %25 = tpu.matmul %24, %6, %cst_14 {dimension_numbers = #tpu.dot_dimension_numbers<[1], [0], [0], [1], [0, 0, 1, 1], [], []>} : vector<2x128xf32>, vector<128x128xf32>, vector<2x128xf32> -> vector<2x128xf32>
    %26 = vector.broadcast %4 : vector<1x128xf32> to vector<2x128xf32>
    %27 = arith.addf %25, %26 : vector<2x128xf32>
    %c0_15 = arith.constant 0 : index
    %c0_16 = arith.constant 0 : index
    %28 = vector.load %arg4[%c0_15, %c0_16] : memref<2x128xf32, #tpu.memory_space<vmem>>, vector<2x128xf32>
    tpu.vector_store %arg4[%c0_15, %c0_16], %27 {strides = array<i32>} : memref<2x128xf32, #tpu.memory_space<vmem>>, vector<2x128xf32>,
    return
  }
  func.func @transform_0(%arg0: i32) -> (i32, i32) {
    %c0_i32 = arith.constant 0 : i32
    %c0_i32_0 = arith.constant 0 : i32
    return %arg0, %c0_i32 : i32, i32
  }
  func.func @transform_1(%arg0: i32) -> (i32, i32) {
    %c0_i32 = arith.constant 0 : i32
    %c0_i32_0 = arith.constant 0 : i32
    %c0_i32_1 = arith.constant 0 : i32
    return %c0_i32, %c0_i32_0 : i32, i32
  }
  func.func @transform_2(%arg0: i32) -> (i32, i32) {
    %c0_i32 = arith.constant 0 : i32
    %c0_i32_0 = arith.constant 0 : i32
    %c0_i32_1 = arith.constant 0 : i32
    return %c0_i32, %c0_i32_0 : i32, i32
  }
  func.func @transform_3(%arg0: i32) -> (i32, i32) {
    %c0_i32 = arith.constant 0 : i32
    %c0_i32_0 = arith.constant 0 : i32
    return %arg0, %c0_i32 : i32, i32
  }
}

</mosaic_0001>

<bundles_post_ra>
// kernel: textcnn_forward.1
= control target key start
LH: loop header
LB: loop body
LE: loop exit
PB: predicated region body
PF: predicated region fallthrough
CT: control target
= control target key end

     0   :  { %8 = vsyncpa [#allocation3], 0  ;;  %s2154_s0 = inlined_call_operand.vmem [shape: f32[224,40], index: 0, kind: input, shape index: {}]   ;;  %s2155_s1 = inlined_call_operand.vmem [shape: f32[160,512], index: 1, kind: input, shape index: {}]   ;;  %s2156_s2 = inlined_call_operand.hbm [shape: f32[640,128], index: 2, kind: input, shape index: {}]   ;;  %s2157_s3 = inlined_call_operand.hbm [shape: f32[2,128], index: 3, kind: output, shape index: {}]  }
   0x1   :  { %9 = vsyncpa [#allocation4], 0  ;;  %s18_s14 = sshll.u32 %s2156_s2, 4  ;;  %s1291_s15 = smov [#allocation2]   ;;  %s19_s14 = int_to_ptr.hbm [resolvable:$true] %s18_s14 }
   0x2   :  { %s20_s16 = sshll.u32 %s1291_s15, 4  ;;  %s1292_s17 = smov 128   ;;  %s21_s16 = int_to_ptr.vmem [resolvable:$true] %s20_s16 }
   0x3   :  { %s1293_s18 = smov 8  }
   0x4   :  { %26 = dma.hbm_to_vmem [thread:$0]  %s19_s14, 10240, %s21_s16, [#allocation3], %s1292_s17, %s1292_s17, %s1293_s18  }
   0x5   :  { %1287 = dma.done.wait [#allocation3], 10240  }
   0x6   :  { %1288 = vsyncadd [#allocation3], 4294957056  ;;  %v47_v0 = vld [vmem:[%s2155_s1 + $0x80] sm:$0xff]  ;;  %v50_v1 = vld [vmem:[%s2155_s1 + $0x98] sm:$0xff]  ;;  %vm219_vm0 = vcmask 326656   ;;  %vm972_vm1 = vcmask 1040384  }
   0x7   :  { %v43_v2 = vld [vmem:[%s2155_s1 + $0x60] sm:$0xff]  ;;  %315 = vmatpush.msra.mxu0 %v47_v0  ;;  %1225 = vmatpush.msra.mxu1 %v47_v0  ;;  %v46_v3 = vld [vmem:[%s2155_s1 + $0x78] sm:$0xff]  ;;  %v1354_v11 = vld [vmem:[%s2154_s0 + $0xc8] sm:$0xff]  ;;  %s1294_s6 = smov [#allocation5]   ;;  %s1102_s10 = sshll.u32 %s2157_s3, 4  ;;  %s1103_s10 = int_to_ptr.hbm [resolvable:$true] %s1102_s10 }
   0x8   :  { %1226 = vmatpush.msra.mxu2 %v47_v0  ;;  %618 = vmatpush.msra.mxu3 %v50_v1  ;;  %v39_v4 = vld [vmem:[%s2155_s1 + $0x40] sm:$0xff]  ;;  %v42_v5 = vld [vmem:[%s2155_s1 + $0x58] sm:$0xff]  ;;  %v49_v12 = vld [vmem:[%s2155_s1 + $0x90] sm:$0xff]  ;;  %s1100_s7 = sshll.u32 %s1294_s6, 4  ;;  %s1101_s7 = int_to_ptr.vmem [resolvable:$true] %s1100_s7 }
   0x9   :  { %316 = vmatpush.msra.mxu0 %v43_v2  ;;  %1227 = vmatpush.msra.mxu1 %v43_v2  ;;  %v35_v6 = vld [vmem:[%s2155_s1 + $0x20] sm:$0xff]  ;;  %v38_v7 = vld [vmem:[%s2155_s1 + $0x38] sm:$0xff]  ;;  %v48_v14 = vld [vmem:[%s2155_s1 + $0x88] sm:$0xff] }
   0xa   :  { %1228 = vmatpush.msra.mxu2 %v43_v2  ;;  %619 = vmatpush.msra.mxu3 %v46_v3  ;;  %v31_v8 = vld [vmem:[%s2155_s1] sm:$0xff]  ;;  %v34_v9 = vld [vmem:[%s2155_s1 + $0x18] sm:$0xff]  ;;  %v45_v15 = vld [vmem:[%s2155_s1 + $0x70] sm:$0xff] }
   0xb   :  { %317 = vmatpush.msra.mxu0 %v39_v4  ;;  %1229 = vmatpush.msra.mxu1 %v39_v4  ;;  %v191_v10 = vld [vmem:[%s2154_s0] sm:$0xff]  ;;  %v1362_v13 = vld [vmem:[%s2154_s0 + $0xd8] sm:$0xff]  ;;  %v44_v16 = vld [vmem:[%s2155_s1 + $0x68] sm:$0xff] }
   0xc   :  { %1230 = vmatpush.msra.mxu2 %v39_v4  ;;  %620 = vmatpush.msra.mxu3 %v42_v5  ;;  %v41_v17 = vld [vmem:[%s2155_s1 + $0x50] sm:$0xff]  ;;  %v40_v18 = vld [vmem:[%s2155_s1 + $0x48] sm:$0xff]  ;;  %v194_v26 = vld [vmem:[%s2154_s0 + $0x18] sm:$0xff] }
   0xd   :  { %318 = vmatpush.msra.mxu0 %v35_v6  ;;  %1231 = vmatpush.msra.mxu1 %v35_v6  ;;  %v37_v19 = vld [vmem:[%s2155_s1 + $0x30] sm:$0xff]  ;;  %v192_v20 = vld [vmem:[%s2154_s0 + $0x8] sm:$0xff]  ;;  %v195_v27 = vld [vmem:[%s2154_s0 + $0x20] sm:$0xff] }
   0xe   :  { %1232 = vmatpush.msra.mxu2 %v35_v6  ;;  %621 = vmatpush.msra.mxu3 %v38_v7  ;;  %v1394_v21 = vld [vmem:[%s2154_s0 + $0xd0] sm:$0xff]  ;;  %v36_v23 = vld [vmem:[%s2155_s1 + $0x28] sm:$0xff]  ;;  %v198_v30 = vld [vmem:[%s2154_s0 + $0x38] sm:$0xff] }
   0xf   :  { %319 = vmatpush.msra.mxu0 %v31_v8  ;;  %1233 = vmatpush.msra.mxu1 %v31_v8  ;;  %v33_v22 = vld [vmem:[%s2155_s1 + $0x10] sm:$0xff]  ;;  %v32_v24 = vld [vmem:[%s2155_s1 + $0x8] sm:$0xff]  ;;  %v199_v31 = vld [vmem:[%s2154_s0 + $0x40] sm:$0xff] }
  0x10   :  { %1234 = vmatpush.msra.mxu2 %v31_v8  ;;  %622 = vmatpush.msra.mxu3 %v34_v9  ;;  %v193_v25 = vld [vmem:[%s2154_s0 + $0x10] sm:$0xff]  ;;  %v196_v28 = vld [vmem:[%s2154_s0 + $0x28] sm:$0xff]  ;;  %v202_v34 = vld [vmem:[%s2154_s0 + $0x58] sm:$0xff] }
  0x11   :  { %1113 = vmatmul.msk.f32.vlgmr.msra.gmra.mxu0 %vm219_vm0, %v191_v10  ;;  %1138 = vmatmul.msk.f32.vlgmr.msra.gmra.mxu1 %vm219_vm0, %v1354_v11  ;;  %v197_v29 = vld [vmem:[%s2154_s0 + $0x30] sm:$0xff]  ;;  %v200_v32 = vld [vmem:[%s2154_s0 + $0x48] sm:$0xff]  ;;  %v203_v35 = vld [vmem:[%s2154_s0 + $0x60] sm:$0xff] }
  0x12   :  { %517 = vmatpush.msrb.mxu2 %v49_v12  ;;  %1197 = vmatmul.msk.f32.vlgmr.msra.gmra.mxu3 %vm219_vm0, %v191_v10  ;;  %v201_v33 = vld [vmem:[%s2154_s0 + $0x50] sm:$0xff]  ;;  %v204_v36 = vld [vmem:[%s2154_s0 + $0x68] sm:$0xff]  ;;  %v206_v38 = vld [vmem:[%s2154_s0 + $0x78] sm:$0xff] }
  0x13   :  { %1140 = vmatmul.msk.f32.vlgmr.msra.gmra.mxu2 %vm219_vm0, %v1362_v13  ;;  %416 = vmatpush.msrb.mxu1 %v48_v14  ;;  %v205_v37 = vld [vmem:[%s2154_s0 + $0x70] sm:$0xff]  ;;  %v158_v39 = vld [vmem:[#allocation2 + $0x178] sm:$0xff]  ;;  %v207_v42 = vld [vmem:[%s2154_s0 + $0x80] sm:$0xff] }
  0x14   :  { %518 = vmatpush.msrb.mxu2 %v45_v15  ;;  %v174_v43 = vld [vmem:[#allocation2 + $0x1f8] sm:$0xff]  ;;  %v208_v48 = vld [vmem:[%s2154_s0 + $0x88] sm:$0xff]  ;;  %v157_v51 = vld [vmem:[#allocation2 + $0x170] sm:$0xff] }
  0x15   :  { %417 = vmatpush.msrb.mxu1 %v44_v16  ;;  %1054 = vmatpush.msrb.mxu3 %v174_v43  ;;  %v142_v44 = vld [vmem:[#allocation2 + $0xf8] sm:$0xff]  ;;  %v173_v52 = vld [vmem:[#allocation2 + $0x1f0] sm:$0xff]  ;;  %v156_v14 = vld [vmem:[#allocation2 + $0x168] sm:$0xff] }
  0x16   :  { %519 = vmatpush.msrb.mxu2 %v41_v17  ;;  %v1533_v50 = vld [vmem:[%s2155_s1 + $0xb8] sm:$0xff]  ;;  %v209_v58 = vld [vmem:[%s2154_s0 + $0x90] sm:$0xff]  ;;  %v1585_v16 = vld [vmem:[%s2155_s1 + $0x100] sm:$0xff] }
  0x17   :  { %418 = vmatpush.msrb.mxu1 %v40_v18  ;;  %v1540_v53 = vld [vmem:[%s2155_s1 + $0xd8] sm:$0xff]  ;;  %1055 = vmatpush.msrb.mxu3 %v173_v52  ;;  %v141_v59 = vld [vmem:[#allocation2 + $0xf0] sm:$0xff]  ;;  %v172_v17 = vld [vmem:[#allocation2 + $0x1e8] sm:$0xff] }
  0x18   :  { %520 = vmatpush.msrb.mxu2 %v37_v19  ;;  %v1558_v63 = vld [vmem:[%s2155_s1 + $0xf8] sm:$0xff]  ;;  %v1563_v0 = vld [vmem:[%s2155_s1 + $0xb0] sm:$0xff]  ;;  %v140_v18 = vld [vmem:[#allocation2 + $0xe8] sm:$0xff] }
  0x19   :  { %1114 = vmatmul.msk.f32.gmra.mxu0 %vm219_vm0, %v192_v20  ;;  %1139 = vmatmul.msk.f32.gmra.mxu1 %vm219_vm0, %v1394_v21  ;;  %v1568_v1 = vld [vmem:[%s2155_s1 + $0xd0] sm:$0xff]  ;;  %v210_v5 = vld [vmem:[%s2154_s0 + $0x98] sm:$0xff]  ;;  %v212_v43 = vld [vmem:[%s2154_s0 + $0xa8] sm:$0xff] }
  0x1a   :  { %521 = vmatpush.msrb.mxu2 %v33_v22  ;;  %1198 = vmatmul.msk.f32.gmra.mxu3 %vm219_vm0, %v192_v20  ;;  %v1592_v19 = vld [vmem:[%s2155_s1 + $0x118] sm:$0xff]  ;;  %v1602_v22 = vld [vmem:[%s2155_s1 + $0xf0] sm:$0xff]  ;;  %v155_v52 = vld [vmem:[#allocation2 + $0x160] sm:$0xff] }
  0x1b   :  { %1169 = vmatmul.msk.f32.vlgmr.msrb.gmra.mxu2 %vm219_vm0, %v191_v10  ;;  %419 = vmatpush.msrb.mxu1 %v36_v23 }
  0x1c   :  { %1034 = vmatpush.msra.mxu2 %v158_v39  ;;  %1056 = vmatpush.msrb.mxu3 %v172_v17 }
  0x1d   :  { %420 = vmatpush.msrb.mxu1 %v32_v24 }
  0x1e   :  { %1035 = vmatpush.msra.mxu2 %v157_v51 }
  0x1f   :  { %1014 = vmatpush.msra.mxu1 %v142_v44 }
  0x20   :  { %1036 = vmatpush.msra.mxu2 %v156_v14 }
  0x21   :  { %1115 = vmatmul.msk.f32.gmra.mxu0 %vm219_vm0, %v193_v25  ;;  %1141 = vmatmul.msk.f32.vlgmr.msrb.gmra.mxu1 %vm219_vm0, %v191_v10  ;;  %v126_v10 = vld [vmem:[#allocation2 + $0x78] sm:$0xff] }
  0x22   :  { %1199 = vmatmul.msk.f32.gmra.mxu3 %vm219_vm0, %v193_v25  ;;  %1015 = vmatpush.msra.mxu1 %v141_v59 }
  0x23   :  { %1170 = vmatmul.msk.f32.gmra.mxu2 %vm219_vm0, %v192_v20  ;;  %994 = vmatpush.msrb.mxu0 %v126_v10  ;;  %v154_v10 = vld [vmem:[#allocation2 + $0x158] sm:$0xff] }
  0x24   :  { %1016 = vmatpush.msra.mxu1 %v140_v18  ;;  %1037 = vmatpush.msra.mxu2 %v155_v52  ;;  %v1715_v52 = vld [vmem:[%s2155_s1 + $0x148] sm:$0xff] }
  0x25   :  { %2184 = vst [vmem:[#allocation10_spill] sm:$0xff] %v1715_v52 }
  0x26   :  { %1038 = vmatpush.msra.mxu2 %v154_v10 }
  0x29   :  { %1116 = vmatmul.msk.f32.gmra.mxu0 %vm219_vm0, %v194_v26  ;;  %1142 = vmatmul.msk.f32.gmra.mxu1 %vm219_vm0, %v192_v20  ;;  %v1597_v20 = vld [vmem:[%s2155_s1 + $0x120] sm:$0xff] }
  0x2a   :  { %1200 = vmatmul.msk.f32.gmra.mxu3 %vm219_vm0, %v194_v26 }
  0x2b   :  { %1171 = vmatmul.msk.f32.gmra.mxu2 %vm219_vm0, %v193_v25 }
  0x31   :  { %1117 = vmatmul.msk.f32.gmra.mxu0 %vm219_vm0, %v195_v27  ;;  %1143 = vmatmul.msk.f32.gmra.mxu1 %vm219_vm0, %v193_v25 }
  0x32   :  { %1201 = vmatmul.msk.f32.gmra.mxu3 %vm219_vm0, %v195_v27 }
  0x33   :  { %1172 = vmatmul.msk.f32.gmra.mxu2 %vm219_vm0, %v194_v26 }
  0x39   :  { %1118 = vmatmul.msk.f32.gmra.mxu0 %vm219_vm0, %v196_v28  ;;  %1144 = vmatmul.msk.f32.gmra.mxu1 %vm219_vm0, %v194_v26 }
  0x3a   :  { %1202 = vmatmul.msk.f32.gmra.mxu3 %vm219_vm0, %v196_v28 }
  0x3b   :  { %1173 = vmatmul.msk.f32.gmra.mxu2 %vm219_vm0, %v195_v27 }
  0x41   :  { %1119 = vmatmul.msk.f32.gmra.mxu0 %vm219_vm0, %v197_v29  ;;  %1145 = vmatmul.msk.f32.gmra.mxu1 %vm219_vm0, %v195_v27  ;;  %v211_v27 = vld [vmem:[%s2154_s0 + $0xa0] sm:$0xff] }
  0x42   :  { %1203 = vmatmul.msk.f32.gmra.mxu3 %vm219_vm0, %v197_v29 }
  0x43   :  { %1174 = vmatmul.msk.f32.gmra.mxu2 %vm219_vm0, %v196_v28 }
  0x49   :  { %1120 = vmatmul.msk.f32.gmra.mxu0 %vm219_vm0, %v198_v30  ;;  %1146 = vmatmul.msk.f32.gmra.mxu1 %vm219_vm0, %v196_v28 }
  0x4a   :  { %1204 = vmatmul.msk.f32.gmra.mxu3 %vm219_vm0, %v198_v30 }
  0x4b   :  { %1175 = vmatmul.msk.f32.gmra.mxu2 %vm219_vm0, %v197_v29 }
  0x51   :  { %1121 = vmatmul.msk.f32.gmra.mxu0 %vm219_vm0, %v199_v31  ;;  %1147 = vmatmul.msk.f32.gmra.mxu1 %vm219_vm0, %v197_v29 }
  0x52   :  { %1205 = vmatmul.msk.f32.gmra.mxu3 %vm219_vm0, %v199_v31 }
  0x53   :  { %1176 = vmatmul.msk.f32.gmra.mxu2 %vm219_vm0, %v198_v30 }
  0x59   :  { %1122 = vmatmul.msk.f32.gmra.mxu0 %vm219_vm0, %v200_v32  ;;  %1148 = vmatmul.msk.f32.gmra.mxu1 %vm219_vm0, %v198_v30 }
  0x5a   :  { %1206 = vmatmul.msk.f32.gmra.mxu3 %vm219_vm0, %v200_v32 }
  0x5b   :  { %1177 = vmatmul.msk.f32.gmra.mxu2 %vm219_vm0, %v199_v31 }
  0x61   :  { %1123 = vmatmul.msk.f32.gmra.mxu0 %vm219_vm0, %v201_v33  ;;  %1149 = vmatmul.msk.f32.gmra.mxu1 %vm219_vm0, %v199_v31 }
  0x62   :  { %1207 = vmatmul.msk.f32.gmra.mxu3 %vm219_vm0, %v201_v33 }
  0x63   :  { %1178 = vmatmul.msk.f32.gmra.mxu2 %vm219_vm0, %v200_v32 }
  0x69   :  { %1124 = vmatmul.msk.f32.gmra.mxu0 %vm219_vm0, %v202_v34  ;;  %1150 = vmatmul.msk.f32.gmra.mxu1 %vm219_vm0, %v200_v32 }
  0x6a   :  { %1208 = vmatmul.msk.f32.gmra.mxu3 %vm219_vm0, %v202_v34 }
  0x6b   :  { %1179 = vmatmul.msk.f32.gmra.mxu2 %vm219_vm0, %v201_v33 }
  0x71   :  { %1125 = vmatmul.msk.f32.gmra.mxu0 %vm219_vm0, %v203_v35  ;;  %1151 = vmatmul.msk.f32.gmra.mxu1 %vm219_vm0, %v201_v33 }
  0x72   :  { %1209 = vmatmul.msk.f32.gmra.mxu3 %vm219_vm0, %v203_v35 }
  0x73   :  { %1180 = vmatmul.msk.f32.gmra.mxu2 %vm219_vm0, %v202_v34 }
  0x79   :  { %1126 = vmatmul.msk.f32.gmra.mxu0 %vm219_vm0, %v204_v36  ;;  %1152 = vmatmul.msk.f32.gmra.mxu1 %vm219_vm0, %v202_v34 }
  0x7a   :  { %1210 = vmatmul.msk.f32.gmra.mxu3 %vm219_vm0, %v204_v36 }
  0x7b   :  { %1181 = vmatmul.msk.f32.gmra.mxu2 %vm219_vm0, %v203_v35 }
  0x81   :  { %1127 = vmatmul.msk.f32.gmra.mxu0 %vm219_vm0, %v205_v37  ;;  %1153 = vmatmul.msk.f32.gmra.mxu1 %vm219_vm0, %v203_v35  ;;  %v125_v35 = vld [vmem:[#allocation2 + $0x70] sm:$0xff] }
  0x82   :  { %1211 = vmatmul.msk.f32.gmra.mxu3 %vm219_vm0, %v205_v37  ;;  %995 = vmatpush.msrb.mxu0 %v125_v35  ;;  %v138_v35 = vld [vmem:[#allocation2 + $0xd8] sm:$0xff] }
  0x83   :  { %1182 = vmatmul.msk.f32.gmra.mxu2 %vm219_vm0, %v204_v36 }
  0x89   :  { %1128 = vmatmul.msk.f32.gmra.mxu0 %vm219_vm0, %v206_v38  ;;  %1154 = vmatmul.msk.f32.gmra.mxu1 %vm219_vm0, %v204_v36  ;;  %v1626_v36 = vld [vmem:[%s2155_s1 + $0x140] sm:$0xff] }
  0x8a   :  { %1212 = vmatmul.msk.f32.gmra.mxu3 %vm219_vm0, %v206_v38 }
  0x8b   :  { %1183 = vmatmul.msk.f32.gmra.mxu2 %vm219_vm0, %v205_v37 }
  0x8e   :  { %v1508_v40 = vpop.f32.mrf.mxu0  ;;  %v1510_v41 = vpop.f32.mrf.mxu1 }
  0x91   :  { %1129 = vmatmul.msk.f32.gmra.mxu0 %vm219_vm0, %v207_v42  ;;  %1155 = vmatmul.msk.f32.gmra.mxu1 %vm219_vm0, %v205_v37  ;;  %v1631_v37 = vld [vmem:[%s2155_s1 + $0x110] sm:$0xff] }
  0x92   :  { %1213 = vmatmul.msk.f32.gmra.mxu3 %vm219_vm0, %v207_v42 }
  0x93   :  { %1184 = vmatmul.msk.f32.gmra.mxu2 %vm219_vm0, %v206_v38 }
  0x95   :  { %v624_v45 = vpop.f32.mrf.mxu3 }
  0x96   :  { %v1519_v46 = vpop.f32.mrf.mxu2  ;;  %v1521_v47 = vpop.f32.mrf.mxu0  ;;  %v711_v54 = vadd.f32 %v624_v45, %v1533_v50 }
  0x97   :  { %v1526_v49 = vpop.f32.mrf.mxu1 }
  0x99   :  { %1130 = vmatmul.msk.f32.gmra.mxu0 %vm219_vm0, %v208_v48  ;;  %1156 = vmatmul.msk.f32.gmra.mxu1 %vm219_vm0, %v206_v38 }
  0x9a   :  { %1214 = vmatmul.msk.f32.gmra.mxu3 %vm219_vm0, %v208_v48 }
  0x9b   :  { %1185 = vmatmul.msk.f32.gmra.mxu2 %vm219_vm0, %v207_v42 }
  0x9d   :  { %v627_v55 = vpop.f32.mrf.mxu3 }
  0x9e   :  { %v523_v56 = vpop.f32.mrf.mxu2  ;;  %v1543_v57 = vpop.f32.mrf.mxu0  ;;  %v715_v60 = vadd.f32 %v627_v55, %v1540_v53  ;;  %v171_v55 = vld [vmem:[#allocation2 + $0x1e0] sm:$0xff] }
  0x9f   :  { %v1549_v61 = vpop.f32.mrf.mxu1  ;;  %v710_v8 = vadd.f32 %v523_v56, %v1563_v0  ;;  %v139_v56 = vld [vmem:[#allocation2 + $0xe0] sm:$0xff]  ;;  %1057 = vmatpush.msrb.mxu3 %v171_v55 }
  0xa0   :  { %v821_v62 = vmax.f32 %v711_v54, %v715_v60  ;;  %1017 = vmatpush.msra.mxu1 %v139_v56  ;;  %v1720_v56 = vld [vmem:[%s2155_s1 + $0x168] sm:$0xff]  ;;  %v137_v54 = vld [vmem:[#allocation2 + $0xd0] sm:$0xff] }
  0xa1   :  { %1131 = vmatmul.msk.f32.gmra.mxu0 %vm219_vm0, %v209_v58  ;;  %1157 = vmatmul.msk.f32.gmra.mxu1 %vm219_vm0, %v207_v42  ;;  %2185 = vst [vmem:[#allocation11_spill] sm:$0xff] %v1720_v56 }
  0xa2   :  { %1215 = vmatmul.msk.f32.gmra.mxu3 %vm219_vm0, %v209_v58  ;;  %1018 = vmatpush.msra.mxu1 %v138_v35 }
  0xa3   :  { %1186 = vmatmul.msk.f32.gmra.mxu2 %vm219_vm0, %v208_v48 }
  0xa4   :  { %1019 = vmatpush.msra.mxu1 %v137_v54 }
  0xa5   :  { %v630_v2 = vpop.f32.mrf.mxu3 }
  0xa6   :  { %v526_v3 = vpop.f32.mrf.mxu2  ;;  %v330_v4 = vpop.f32.mrf.mxu0  ;;  %v719_v6 = vadd.f32 %v630_v2, %v1558_v63  ;;  %v213_v2 = vld [vmem:[%s2154_s0 + $0xb0] sm:$0xff] }
  0xa7   :  { %v1574_v7 = vpop.f32.mrf.mxu1  ;;  %v714_v9 = vadd.f32 %v526_v3, %v1568_v1  ;;  %v720_v23 = vadd.f32 %v330_v4, %v1585_v16 }
  0xa8   :  { %v1578_v12 = vmax.f32 %v821_v62, %v719_v6 }
  0xa9   :  { %1132 = vmatmul.msk.f32.gmra.mxu0 %vm219_vm0, %v210_v5  ;;  %1158 = vmatmul.msk.f32.gmra.mxu1 %vm219_vm0, %v208_v48  ;;  %v802_v15 = vmax.f32 %v710_v8, %v714_v9  ;;  %v124_v8 = vld [vmem:[#allocation2 + $0x68] sm:$0xff]  ;;  %v1675_v9 = vld [vmem:[%s2155_s1 + $0x178] sm:$0xff] }
  0xaa   :  { %1216 = vmatmul.msk.f32.gmra.mxu3 %vm219_vm0, %v210_v5  ;;  %996 = vmatpush.msrb.mxu0 %v124_v8 }
  0xab   :  { %1187 = vmatmul.msk.f32.gmra.mxu2 %vm219_vm0, %v209_v58 }
  0xad   :  { %v633_v24 = vpop.f32.mrf.mxu3 }
  0xae   :  { %v529_v25 = vpop.f32.mrf.mxu2  ;;  %v333_v26 = vpop.f32.mrf.mxu0  ;;  %v1609_v28 = vadd.f32 %v633_v24, %v1592_v19 }
  0xaf   :  { %v724_v29 = vadd.f32 %v333_v26, %v1597_v20  ;;  %v1612_v30 = vpop.f32.mrf.mxu1  ;;  %v718_v31 = vadd.f32 %v529_v25, %v1602_v22  ;;  %v214_v25 = vld [vmem:[%s2154_s0 + $0xb8] sm:$0xff] }
  0xb1   :  { %v766_v33 = vmax.f32 %v724_v29, %v720_v23  ;;  %1133 = vmatmul.msk.f32.gmra.mxu0 %vm219_vm0, %v211_v27  ;;  %1159 = vmatmul.msk.f32.gmra.mxu1 %vm219_vm0, %v209_v58  ;;  %v1619_v34 = vmax.f32 %v802_v15, %v718_v31  ;;  %v1653_v58 = vld [vmem:[%s2155_s1 + $0x160] sm:$0xff] }
  0xb2   :  { %1217 = vmatmul.msk.f32.gmra.mxu3 %vm219_vm0, %v211_v27  ;;  %v1681_v15 = vld [vmem:[%s2155_s1 + $0x180] sm:$0xff] }
  0xb3   :  { %1188 = vmatmul.msk.f32.gmra.mxu2 %vm219_vm0, %v210_v5 }
  0xb5   :  { %v1633_v38 = vpop.f32.mrf.mxu3 }
  0xb6   :  { %v532_v39 = vpop.f32.mrf.mxu2  ;;  %v336_v42 = vpop.f32.mrf.mxu0 }
  0xb7   :  { %v728_v44 = vadd.f32 %v336_v42, %v1626_v36  ;;  %v1639_v45 = vpop.f32.mrf.mxu1  ;;  %v1642_v48 = vadd.f32 %v532_v39, %v1631_v37  ;;  %v1695_v39 = vld [vmem:[%s2155_s1 + $0x198] sm:$0xff]  ;;  %v123_v42 = vld [vmem:[#allocation2 + $0x60] sm:$0xff] }
  0xb8   :  { %997 = vmatpush.msrb.mxu0 %v123_v42 }
  0xb9   :  { %v767_v51 = vmax.f32 %v766_v33, %v728_v44  ;;  %1134 = vmatmul.msk.f32.gmra.mxu0 %vm219_vm0, %v212_v43  ;;  %1160 = vmatmul.msk.f32.gmra.mxu1 %vm219_vm0, %v210_v5  ;;  %v1666_v5 = vld [vmem:[%s2155_s1 + $0x158] sm:$0xff]  ;;  %v1700_v44 = vld [vmem:[%s2155_s1 + $0x150] sm:$0xff] }
  0xba   :  { %1218 = vmatmul.msk.f32.gmra.mxu3 %vm219_vm0, %v212_v43  ;;  %v170_v33 = vld [vmem:[#allocation2 + $0x1d8] sm:$0xff]  ;;  %2182 = vst [vmem:[#allocation8_spill] sm:$0xff] %v1700_v44 }
  0xbb   :  { %1189 = vmatmul.msk.f32.gmra.mxu2 %vm219_vm0, %v211_v27  ;;  %1058 = vmatpush.msrb.mxu3 %v170_v33 }
  0xbd   :  { %v639_v59 = vpop.f32.mrf.mxu3 }
  0xbe   :  { %v1655_v60 = vpop.f32.mrf.mxu2  ;;  %v339_v62 = vpop.f32.mrf.mxu0  ;;  %v731_v14 = vadd.f32 %v639_v59, %v1666_v5 }
  0xbf   :  { %v732_v3 = vadd.f32 %v339_v62, %v1653_v58  ;;  %v1661_v4 = vpop.f32.mrf.mxu1 }
  0xc1   :  { %v768_v6 = vmax.f32 %v767_v51, %v732_v3  ;;  %1135 = vmatmul.msk.f32.gmra.mxu0 %vm219_vm0, %v213_v2  ;;  %1161 = vmatmul.msk.f32.gmra.mxu1 %vm219_vm0, %v211_v27  ;;  %v1710_v51 = vld [vmem:[%s2155_s1 + $0x1a0] sm:$0xff] }
  0xc2   :  { %1219 = vmatmul.msk.f32.gmra.mxu3 %vm219_vm0, %v213_v2 }
  0xc3   :  { %1190 = vmatmul.msk.f32.gmra.mxu2 %vm219_vm0, %v212_v43 }
  0xc5   :  { %v642_v17 = vpop.f32.mrf.mxu3 }
  0xc6   :  { %v735_v18 = vadd.f32 %v642_v17, %v1675_v9  ;;  %v538_v23 = vpop.f32.mrf.mxu2  ;;  %v342_v24 = vpop.f32.mrf.mxu0 }
  0xc7   :  { %v736_v26 = vadd.f32 %v342_v24, %v1681_v15  ;;  %v437_v27 = vpop.f32.mrf.mxu1  ;;  %v730_v8 = vadd.f32 %v538_v23, %v1700_v44  ;;  %v153_v23 = vld [vmem:[#allocation2 + $0x150] sm:$0xff] }
  0xc8   :  { %v825_v29 = vmax.f32 %v735_v18, %v731_v14  ;;  %v729_v18 = vadd.f32 %v437_v27, %v1715_v52  ;;  %v169_v27 = vld [vmem:[#allocation2 + $0x1d0] sm:$0xff]  ;;  %1039 = vmatpush.msra.mxu2 %v153_v23 }
  0xc9   :  { %v769_v31 = vmax.f32 %v768_v6, %v736_v26  ;;  %1136 = vmatmul.msk.f32.gmra.mxu0 %vm219_vm0, %v214_v25  ;;  %1162 = vmatmul.msk.f32.gmra.mxu1 %vm219_vm0, %v212_v43  ;;  %v1705_v43 = vld [vmem:[%s2155_s1 + $0x170] sm:$0xff]  ;;  %v215_v6 = vld [vmem:[%s2154_s0 + $0xc0] sm:$0xff] }
  0xca   :  { %1220 = vmatmul.msk.f32.gmra.mxu3 %vm219_vm0, %v214_v25  ;;  %2183 = vst [vmem:[#allocation9_spill] sm:$0xff] %v1705_v43 }
  0xcb   :  { %1191 = vmatmul.msk.f32.gmra.mxu2 %vm219_vm0, %v213_v2  ;;  %1059 = vmatpush.msrb.mxu3 %v169_v27 }
  0xcd   :  { %v645_v55 = vpop.f32.mrf.mxu3 }
  0xce   :  { %v739_v59 = vadd.f32 %v645_v55, %v1695_v39  ;;  %v541_v62 = vpop.f32.mrf.mxu2  ;;  %v345_v3 = vpop.f32.mrf.mxu0  ;;  %v1738_v55 = vld [vmem:[%s2155_s1 + $0x1b8] sm:$0xff] }
  0xcf   :  { %v734_v10 = vadd.f32 %v541_v62, %v1705_v43  ;;  %v740_v14 = vadd.f32 %v345_v3, %v1710_v51  ;;  %v440_v17 = vpop.f32.mrf.mxu1  ;;  %v136_v43 = vld [vmem:[#allocation2 + $0xc8] sm:$0xff] }
  0xd0   :  { %v826_v24 = vmax.f32 %v825_v29, %v739_v59  ;;  %v733_v26 = vadd.f32 %v440_v17, %v1720_v56  ;;  %v1743_v29 = vld [vmem:[%s2155_s1 + $0x190] sm:$0xff]  ;;  %v1753_v59 = vld [vmem:[%s2155_s1 + $0x188] sm:$0xff]  ;;  %1020 = vmatpush.msra.mxu1 %v136_v43 }
  0xd1   :  { %v806_v33 = vmax.f32 %v734_v10, %v730_v8  ;;  %v770_v35 = vmax.f32 %v769_v31, %v740_v14  ;;  %1137 = vmatmul.msk.f32.gmra.mxu0 %vm219_vm0, %v215_v6  ;;  %1163 = vmatmul.msk.f32.gmra.mxu1 %vm219_vm0, %v213_v2  ;;  %2186 = vst [vmem:[#allocation12_spill] sm:$0xff] %v1743_v29  ;;  %v1748_v2 = vld [vmem:[%s2155_s1 + $0x1c0] sm:$0xff]  ;;  %v152_v56 = vld [vmem:[#allocation2 + $0x148] sm:$0xff] }
  0xd2   :  { %v787_v42 = vmax.f32 %v733_v26, %v729_v18  ;;  %1221 = vmatmul.msk.f32.gmra.mxu3 %vm219_vm0, %v215_v6  ;;  %2187 = vst [vmem:[#allocation13_spill] sm:$0xff] %v1753_v59  ;;  %1040 = vmatpush.msra.mxu2 %v152_v56 }
  0xd3   :  { %1192 = vmatmul.msk.f32.gmra.mxu2 %vm219_vm0, %v214_v25 }
  0xd5   :  { %v648_v31 = vpop.f32.mrf.mxu3 }
  0xd6   :  { %v743_v62 = vadd.f32 %v648_v31, %v1738_v55  ;;  %v544_v3 = vpop.f32.mrf.mxu2  ;;  %v348_v8 = vpop.f32.mrf.mxu0  ;;  %v122_v31 = vld [vmem:[#allocation2 + $0x58] sm:$0xff] }
  0xd7   :  { %v738_v10 = vadd.f32 %v544_v3, %v1743_v29  ;;  %v744_v14 = vadd.f32 %v348_v8, %v1748_v2  ;;  %v443_v17 = vpop.f32.mrf.mxu1  ;;  %v1766_v3 = vld [vmem:[%s2155_s1 + $0x1d8] sm:$0xff]  ;;  %998 = vmatpush.msrb.mxu0 %v122_v31 }
  0xd8   :  { %v827_v18 = vmax.f32 %v826_v24, %v743_v62  ;;  %v737_v26 = vadd.f32 %v443_v17, %v1753_v59  ;;  %v1771_v24 = vld [vmem:[%s2155_s1 + $0x1b0] sm:$0xff] }
  0xd9   :  { %v807_v23 = vmax.f32 %v806_v33, %v738_v10  ;;  %v771_v27 = vmax.f32 %v770_v35, %v744_v14  ;;  %1164 = vmatmul.msk.f32.gmra.mxu1 %vm219_vm0, %v214_v25  ;;  %2188 = vst [vmem:[#allocation14_spill] sm:$0xff] %v1771_v24  ;;  %v1776_v25 = vld [vmem:[%s2155_s1 + $0x1e0] sm:$0xff]  ;;  %v1781_v33 = vld [vmem:[%s2155_s1 + $0x1a8] sm:$0xff] }
  0xda   :  { %v788_v32 = vmax.f32 %v787_v42, %v737_v26  ;;  %1222 = vmatmul.msk.f32.gmra.mxu3 %vm219_vm0, %v1354_v11  ;;  %2189 = vst [vmem:[#allocation15_spill] sm:$0xff] %v1781_v33 }
  0xdb   :  { %1193 = vmatmul.msk.f32.gmra.mxu2 %vm219_vm0, %v215_v6 }
  0xdd   :  { %v651_v54 = vpop.f32.mrf.mxu3 }
  0xde   :  { %v747_v35 = vadd.f32 %v651_v54, %v1766_v3  ;;  %v547_v42 = vpop.f32.mrf.mxu2  ;;  %v351_v62 = vpop.f32.mrf.mxu0  ;;  %v168_v54 = vld [vmem:[#allocation2 + $0x1c8] sm:$0xff] }
  0xdf   :  { %v742_v8 = vadd.f32 %v547_v42, %v1771_v24  ;;  %v748_v10 = vadd.f32 %v351_v62, %v1776_v25  ;;  %v446_v14 = vpop.f32.mrf.mxu1  ;;  %1060 = vmatpush.msrb.mxu3 %v168_v54  ;;  %v1811_v42 = vld [vmem:[%s2155_s1 + $0x200] sm:$0xff] }
  0xe0   :  { %v828_v17 = vmax.f32 %v827_v18, %v747_v35  ;;  %v741_v26 = vadd.f32 %v446_v14, %v1781_v33  ;;  %v1795_v18 = vld [vmem:[%s2155_s1 + $0x1f8] sm:$0xff]  ;;  %v151_v24 = vld [vmem:[#allocation2 + $0x140] sm:$0xff] }
  0xe1   :  { %v808_v31 = vmax.f32 %v807_v23, %v742_v8  ;;  %v772_v59 = vmax.f32 %v771_v27, %v748_v10  ;;  %1165 = vmatmul.msk.f32.gmra.mxu1 %vm219_vm0, %v215_v6  ;;  %2190 = vst [vmem:[#allocation16_spill] sm:$0xff] %v1795_v18  ;;  %v1800_v6 = vld [vmem:[%s2155_s1 + $0x1d0] sm:$0xff]  ;;  %v1805_v23 = vld [vmem:[%s2155_s1 + $0x1c8] sm:$0xff]  ;;  %1041 = vmatpush.msra.mxu2 %v151_v24 }
  0xe2   :  { %v789_v29 = vmax.f32 %v788_v32, %v741_v26  ;;  %1223 = vmatmul.msk.f32.gmra.mxu3 %vm219_vm0, %v1394_v21  ;;  %2191 = vst [vmem:[#allocation17_spill] sm:$0xff] %v1800_v6  ;;  %v121_v8 = vld [vmem:[#allocation2 + $0x50] sm:$0xff]  ;;  %v1882_v24 = vld [vmem:[%s2155_s1 + $0x208] sm:$0xff] }
  0xe3   :  { %1194 = vmatmul.msk.f32.gmra.mxu2 %vm219_vm0, %v1354_v11  ;;  %2192 = vst [vmem:[#allocation18_spill] sm:$0xff] %v1805_v23  ;;  %999 = vmatpush.msrb.mxu0 %v121_v8 }
  0xe4   :  { %2198 = vst [vmem:[#allocation24_spill] sm:$0xff] %v1882_v24 }
  0xe5   :  { %v654_v32 = vpop.f32.mrf.mxu3 }
  0xe6   :  { %v751_v27 = vadd.f32 %v654_v32, %v1795_v18  ;;  %v550_v35 = vpop.f32.mrf.mxu2  ;;  %v354_v62 = vpop.f32.mrf.mxu0 }
  0xe7   :  { %v746_v10 = vadd.f32 %v550_v35, %v1800_v6  ;;  %v752_v43 = vadd.f32 %v354_v62, %v1811_v42  ;;  %v449_v56 = vpop.f32.mrf.mxu1  ;;  %v1825_v35 = vld [vmem:[%s2155_s1 + $0x218] sm:$0xff]  ;;  %v1846_v62 = vld [vmem:[%s2155_s1 + $0x220] sm:$0xff] }
  0xe8   :  { %v829_v14 = vmax.f32 %v828_v17, %v751_v27  ;;  %v745_v26 = vadd.f32 %v449_v56, %v1805_v23  ;;  %2193 = vst [vmem:[#allocation19_spill] sm:$0xff] %v1825_v35  ;;  %v1830_v17 = vld [vmem:[%s2155_s1 + $0x1f0] sm:$0xff] }
  0xe9   :  { %v809_v54 = vmax.f32 %v808_v31, %v746_v10  ;;  %v773_v33 = vmax.f32 %v772_v59, %v752_v43  ;;  %1166 = vmatmul.msk.f32.gmra.mxu1 %vm219_vm0, %v1354_v11  ;;  %2194 = vst [vmem:[#allocation20_spill] sm:$0xff] %v1830_v17  ;;  %v1835_v11 = vld [vmem:[%s2155_s1 + $0x1e8] sm:$0xff]  ;;  %v1851_v10 = vld [vmem:[%s2155_s1 + $0xc0] sm:$0xff] }
  0xea   :  { %v790_v32 = vmax.f32 %v789_v29, %v745_v26  ;;  %1224 = vmatmul.msk.f32.gmra.mxu3 %vm219_vm0, %v1362_v13  ;;  %2195 = vst [vmem:[#allocation21_spill] sm:$0xff] %v1835_v11  ;;  %v1840_v29 = vld [vmem:[%s2155_s1 + $0xa0] sm:$0xff]  ;;  %v712_v52 = vadd.f32 %v1521_v47, %v1851_v10 }
  0xeb   :  { %1195 = vmatmul.msk.f32.gmra.mxu2 %vm219_vm0, %v1394_v21  ;;  %v708_v6 = vadd.f32 %v1508_v40, %v1840_v29  ;;  %v1877_v40 = vld [vmem:[%s2155_s1 + $0x210] sm:$0xff] }
  0xec   :  { %2197 = vst [vmem:[#allocation23_spill] sm:$0xff] %v1877_v40 }
  0xed   :  { %v657_v59 = vpop.f32.mrf.mxu3 }
  0xee   :  { %v755_v31 = vadd.f32 %v657_v59, %v1825_v35  ;;  %v553_v27 = vpop.f32.mrf.mxu2  ;;  %v357_v8 = vpop.f32.mrf.mxu0 }
  0xef   :  { %v750_v43 = vadd.f32 %v553_v27, %v1830_v17  ;;  %v756_v56 = vadd.f32 %v357_v8, %v1846_v62  ;;  %v452_v26 = vpop.f32.mrf.mxu1  ;;  %v167_v27 = vld [vmem:[#allocation2 + $0x1c0] sm:$0xff]  ;;  %v120_v17 = vld [vmem:[#allocation2 + $0x48] sm:$0xff] }
  0xf0   :  { %v830_v23 = vmax.f32 %v829_v14, %v755_v31  ;;  %v749_v59 = vadd.f32 %v452_v26, %v1835_v11  ;;  %v135_v8 = vld [vmem:[#allocation2 + $0xc0] sm:$0xff]  ;;  %1061 = vmatpush.msrb.mxu3 %v167_v27  ;;  %1000 = vmatpush.msrb.mxu0 %v120_v17 }
  0xf1   :  { %v810_v35 = vmax.f32 %v809_v54, %v750_v43  ;;  %v774_v18 = vmax.f32 %v773_v33, %v756_v56  ;;  %1167 = vmatmul.msk.f32.gmra.mxu1 %vm219_vm0, %v1394_v21  ;;  %v1865_v14 = vld [vmem:[%s2155_s1 + $0xe0] sm:$0xff]  ;;  %v1872_v21 = vld [vmem:[%s2155_s1 + $0x238] sm:$0xff]  ;;  %v764_v33 = vmax.f32 %v708_v6, %v712_v52 }
  0xf2   :  { %v791_v44 = vmax.f32 %v790_v32, %v749_v59  ;;  %2196 = vst [vmem:[#allocation22_spill] sm:$0xff] %v1872_v21  ;;  %1021 = vmatpush.msra.mxu1 %v135_v8  ;;  %v716_v54 = vadd.f32 %v1543_v57, %v1865_v14  ;;  %v1890_v31 = vld [vmem:[%s2155_s1 + $0x240] sm:$0xff] }
  0xf3   :  { %1196 = vmatmul.msk.f32.gmra.mxu2 %vm219_vm0, %v1362_v13 }
  0xf4   :  { %v765_v57 = vmax.f32 %v764_v33, %v716_v54 }
  0xf5   :  { %v660_v47 = vpop.f32.mrf.mxu3 }
  0xf6   :  { %v759_v32 = vadd.f32 %v660_v47, %v1872_v21  ;;  %v556_v17 = vpop.f32.mrf.mxu2  ;;  %v360_v43 = vpop.f32.mrf.mxu0  ;;  %v1900_v47 = vld [vmem:[%s2155_s1 + $0x138] sm:$0xff] }
  0xf7   :  { %v754_v56 = vadd.f32 %v556_v17, %v1877_v40  ;;  %v760_v26 = vadd.f32 %v360_v43, %v1890_v31  ;;  %v455_v59 = vpop.f32.mrf.mxu1  ;;  %v150_v21 = vld [vmem:[#allocation2 + $0x138] sm:$0xff] }
  0xf8   :  { %v831_v27 = vmax.f32 %v830_v23, %v759_v32  ;;  %v753_v52 = vadd.f32 %v455_v59, %v1882_v24  ;;  %v1905_v17 = vld [vmem:[%s2155_s1 + $0x258] sm:$0xff]  ;;  %1042 = vmatpush.msra.mxu2 %v150_v21 }
  0xf9   :  { %v811_v6 = vmax.f32 %v810_v35, %v754_v56  ;;  %v775_v8 = vmax.f32 %v774_v18, %v760_v26  ;;  %1168 = vmatmul.msk.f32.gmra.mxu1 %vm219_vm0, %v1362_v13  ;;  %2199 = vst [vmem:[#allocation25_spill] sm:$0xff] %v1905_v17  ;;  %v1912_v13 = vld [vmem:[%s2155_s1 + $0x230] sm:$0xff]  ;;  %v727_v18 = vadd.f32 %v1633_v38, %v1900_v47 }
  0xfa   :  { %v792_v11 = vmax.f32 %v791_v44, %v753_v52  ;;  %2200 = vst [vmem:[#allocation26_spill] sm:$0xff] %v1912_v13  ;;  %v1919_v44 = vld [vmem:[%s2155_s1 + $0x228] sm:$0xff]  ;;  %v2202_v38 = vmax.f32 %v1578_v12, %v1609_v28  ;;  %v1939_v12 = vld [vmem:[%s2155_s1 + $0x250] sm:$0xff] }
  0xfb   :  { %v1907_v23 = vmax.f32 %v775_v8, %v765_v57  ;;  %2201 = vst [vmem:[#allocation27_spill] sm:$0xff] %v1919_v44  ;;  %v119_v8 = vld [vmem:[#allocation2 + $0x40] sm:$0xff]  ;;  %v166_v57 = vld [vmem:[#allocation2 + $0x1b8] sm:$0xff] }
  0xfc   :  { %v824_v59 = vmax.f32 %v2202_v38, %v727_v18  ;;  %1001 = vmatpush.msrb.mxu0 %v119_v8  ;;  %1062 = vmatpush.msrb.mxu3 %v166_v57  ;;  %2204 = vst [vmem:[#allocation29_spill] sm:$0xff] %v1939_v12  ;;  %v118_v8 = vld [vmem:[#allocation2 + $0x38] sm:$0xff]  ;;  %v149_v57 = vld [vmem:[#allocation2 + $0x130] sm:$0xff] }
  0xfd   :  { %v663_v35 = vpop.f32.mrf.mxu3  ;;  %1043 = vmatpush.msra.mxu2 %v149_v57 }
  0xfe   :  { %v763_v33 = vadd.f32 %v663_v35, %v1905_v17  ;;  %v559_v54 = vpop.f32.mrf.mxu2  ;;  %v1922_v32 = vpop.f32.mrf.mxu0  ;;  %v134_v35 = vld [vmem:[#allocation2 + $0xb8] sm:$0xff]  ;;  %1002 = vmatpush.msrb.mxu0 %v118_v8 }
  0xff   :  { %v758_v21 = vadd.f32 %v559_v54, %v1912_v13  ;;  %v458_v43 = vpop.f32.mrf.mxu1  ;;  %v1934_v54 = vld [vmem:[%s2155_s1 + $0x130] sm:$0xff]  ;;  %1022 = vmatpush.msra.mxu1 %v134_v35 }
 0x100   :  { %v832_v56 = vmax.f32 %v831_v27, %v763_v33  ;;  %v757_v26 = vadd.f32 %v458_v43, %v1919_v44  ;;  %v726_v27 = vadd.f32 %v1655_v60, %v1934_v54  ;;  %v165_v35 = vld [vmem:[#allocation2 + $0x1b0] sm:$0xff] }
 0x101   :  { %v812_v52 = vmax.f32 %v811_v6, %v758_v21  ;;  %1063 = vmatpush.msrb.mxu3 %v165_v35  ;;  %v117_v35 = vld [vmem:[#allocation2 + $0x30] sm:$0xff] }
 0x102   :  { %v793_v24 = vmax.f32 %v792_v11, %v757_v26  ;;  %v1929_v40 = vmax.f32 %v832_v56, %v824_v59  ;;  %v1944_v11 = vld [vmem:[%s2155_s1 + $0x248] sm:$0xff]  ;;  %v2206_v26 = vmax.f32 %v1619_v34, %v1642_v48  ;;  %v133_v48 = vld [vmem:[#allocation2 + $0xb0] sm:$0xff]  ;;  %1003 = vmatpush.msrb.mxu0 %v117_v35 }
 0x103   :  { %2205 = vst [vmem:[#allocation30_spill] sm:$0xff] %v1944_v11  ;;  %1023 = vmatpush.msra.mxu1 %v133_v48 }
 0x104   :  { %2203 = vst [vmem:[#allocation28_spill] sm:$0xff] %v1929_v40  ;;  %v805_v38 = vmax.f32 %v2206_v26, %v726_v27 }
 0x105   :  { %v666_v28 = vpop.f32.mrf.mxu3 }
 0x106   :  { %v562_v6 = vpop.f32.mrf.mxu2  ;;  %v1948_v18 = vpop.f32.mrf.mxu0  ;;  %v843_v44 = vadd.f32 %v666_v28, %v1533_v50  ;;  %v1966_v50 = vld [vmem:[%s2155_s1 + $0xa8] sm:$0xff] }
 0x107   :  { %v762_v33 = vadd.f32 %v562_v6, %v1939_v12  ;;  %v461_v21 = vpop.f32.mrf.mxu1 }
 0x108   :  { %v761_v43 = vadd.f32 %v461_v21, %v1944_v11 }
 0x109   :  { %v813_v56 = vmax.f32 %v812_v52, %v762_v33 }
 0x10a   :  { %v1955_v59 = vmax.f32 %v793_v24, %v761_v43 }
 0x10b   :  { %v1957_v60 = vmax.f32 %v813_v56, %v805_v38 }
 0x10c   :  { %2207 = vst [vmem:[#allocation31_spill] sm:$0xff] %v1955_v59 }
 0x10d   :  { %2208 = vst [vmem:[#allocation32_spill] sm:$0xff] %v1957_v60  ;;  %v669_v6 = vpop.f32.mrf.mxu3 }
 0x10e   :  { %v847_v21 = vadd.f32 %v669_v6, %v1540_v53  ;;  %v565_v52 = vpop.f32.mrf.mxu2  ;;  %v369_v33 = vpop.f32.mrf.mxu0  ;;  %v148_v6 = vld [vmem:[#allocation2 + $0x128] sm:$0xff] }
 0x10f   :  { %v464_v11 = vpop.f32.mrf.mxu1  ;;  %v842_v56 = vadd.f32 %v565_v52, %v1563_v0  ;;  %1044 = vmatpush.msra.mxu2 %v148_v6  ;;  %v147_v6 = vld [vmem:[#allocation2 + $0x120] sm:$0xff] }
 0x110   :  { %v953_v34 = vmax.f32 %v843_v44, %v847_v21  ;;  %v1972_v44 = vld [vmem:[%s2155_s1 + $0xc8] sm:$0xff]  ;;  %v841_v38 = vadd.f32 %v464_v11, %v1966_v50 }
 0x111   :  { %v164_v21 = vld [vmem:[#allocation2 + $0x1a8] sm:$0xff]  ;;  %1045 = vmatpush.msra.mxu2 %v147_v6 }
 0x112   :  { %1064 = vmatpush.msrb.mxu3 %v164_v21  ;;  %v163_v21 = vld [vmem:[#allocation2 + $0x1a0] sm:$0xff] }
 0x114   :  { %1065 = vmatpush.msrb.mxu3 %v163_v21 }
 0x115   :  { %v672_v24 = vpop.f32.mrf.mxu3 }
 0x116   :  { %v851_v27 = vadd.f32 %v672_v24, %v1558_v63  ;;  %v568_v43 = vpop.f32.mrf.mxu2  ;;  %v372_v26 = vpop.f32.mrf.mxu0 }
 0x117   :  { %v846_v53 = vadd.f32 %v568_v43, %v1568_v1  ;;  %v467_v28 = vpop.f32.mrf.mxu1  ;;  %v132_v1 = vld [vmem:[#allocation2 + $0xa8] sm:$0xff]  ;;  %v852_v17 = vadd.f32 %v372_v26, %v1585_v16  ;;  %v161_v26 = vld [vmem:[#allocation2 + $0x190] sm:$0xff] }
 0x118   :  { %v1975_v63 = vmax.f32 %v953_v34, %v851_v27  ;;  %v845_v8 = vadd.f32 %v467_v28, %v1972_v44  ;;  %1024 = vmatpush.msra.mxu1 %v132_v1  ;;  %v1984_v34 = vld [vmem:[%s2155_s1 + $0xe8] sm:$0xff]  ;;  %v131_v1 = vld [vmem:[#allocation2 + $0xa0] sm:$0xff] }
 0x119   :  { %v934_v0 = vmax.f32 %v842_v56, %v846_v53  ;;  %v116_v28 = vld [vmem:[#allocation2 + $0x28] sm:$0xff] }
 0x11a   :  { %v915_v57 = vmax.f32 %v841_v38, %v845_v8  ;;  %1004 = vmatpush.msrb.mxu0 %v116_v28  ;;  %1025 = vmatpush.msra.mxu1 %v131_v1  ;;  %v848_v1 = vadd.f32 %v369_v33, %v1865_v14  ;;  %v130_v14 = vld [vmem:[#allocation2 + $0x98] sm:$0xff] }
 0x11b   :  { %v114_v33 = vld [vmem:[#allocation2 + $0x18] sm:$0xff] }
 0x11c   :  { %1026 = vmatpush.msra.mxu1 %v130_v14 }
 0x11d   :  { %v1978_v52 = vpop.f32.mrf.mxu3 }
 0x11e   :  { %v571_v48 = vpop.f32.mrf.mxu2  ;;  %v375_v24 = vpop.f32.mrf.mxu0 }
 0x11f   :  { %v850_v11 = vadd.f32 %v571_v48, %v1602_v22  ;;  %v470_v27 = vpop.f32.mrf.mxu1 }
 0x120   :  { %v849_v43 = vadd.f32 %v470_v27, %v1984_v34  ;;  %v840_v27 = vadd.f32 %v1922_v32, %v1840_v29 }
 0x121   :  { %v1987_v56 = vmax.f32 %v934_v0, %v850_v11 }
 0x122   :  { %v1989_v53 = vmax.f32 %v915_v57, %v849_v43  ;;  %v844_v43 = vadd.f32 %v1948_v18, %v1851_v10  ;;  %v856_v10 = vadd.f32 %v375_v24, %v1597_v20 }
 0x124   :  { %2209 = vst [vmem:[#allocation33_spill] sm:$0xff] %v1989_v53  ;;  %v896_v21 = vmax.f32 %v840_v27, %v844_v43  ;;  %v146_v53 = vld [vmem:[#allocation2 + $0x118] sm:$0xff]  ;;  %v145_v43 = vld [vmem:[#allocation2 + $0x110] sm:$0xff] }
 0x125   :  { %v1991_v38 = vpop.f32.mrf.mxu3  ;;  %v162_v27 = vld [vmem:[#allocation2 + $0x198] sm:$0xff]  ;;  %1046 = vmatpush.msra.mxu2 %v146_v53 }
 0x126   :  { %v1993_v8 = vpop.f32.mrf.mxu2  ;;  %v378_v35 = vpop.f32.mrf.mxu0  ;;  %v897_v60 = vmax.f32 %v896_v21, %v848_v1  ;;  %1066 = vmatpush.msrb.mxu3 %v162_v27  ;;  %v129_v27 = vld [vmem:[#allocation2 + $0x90] sm:$0xff] }
 0x127   :  { %v1995_v22 = vpop.f32.mrf.mxu1  ;;  %v860_v16 = vadd.f32 %v378_v35, %v1626_v36  ;;  %1047 = vmatpush.msra.mxu2 %v145_v43  ;;  %v112_v36 = vld [vmem:[#allocation2 + $0x8] sm:$0xff]  ;;  %1027 = vmatpush.msra.mxu1 %v129_v27 }
 0x128   :  { %v898_v32 = vmax.f32 %v897_v60, %v852_v17  ;;  %1067 = vmatpush.msrb.mxu3 %v161_v26  ;;  %v113_v60 = vld [vmem:[#allocation2 + $0x10] sm:$0xff] }
 0x12a   :  { %v899_v21 = vmax.f32 %v898_v32, %v856_v10 }
 0x12d   :  { %v1997_v48 = vpop.f32.mrf.mxu3 }
 0x12e   :  { %v1999_v0 = vpop.f32.mrf.mxu2  ;;  %v381_v57 = vpop.f32.mrf.mxu0 }
 0x12f   :  { %v2001_v11 = vpop.f32.mrf.mxu1  ;;  %v864_v20 = vadd.f32 %v381_v57, %v1653_v58  ;;  %v111_v58 = vld [vmem:[#allocation2] sm:$0xff] }
 0x135   :  { %v2007_v28 = vpop.f32.mrf.mxu3 }
 0x136   :  { %v2009_v6 = vpop.f32.mrf.mxu2  ;;  %v384_v12 = vpop.f32.mrf.mxu0 }
 0x137   :  { %2210 = vst [vmem:[#allocation34_spill] sm:$0xff] %v2009_v6  ;;  %v2012_v13 = vpop.f32.mrf.mxu1  ;;  %v115_v6 = vld [vmem:[#allocation2 + $0x20] sm:$0xff]  ;;  %v868_v1 = vadd.f32 %v384_v12, %v1681_v15 }
 0x138   :  { %1005 = vmatpush.msrb.mxu0 %v115_v6  ;;  %v900_v6 = vmax.f32 %v899_v21, %v860_v16 }
 0x13a   :  { %1006 = vmatpush.msrb.mxu0 %v114_v33  ;;  %v901_v35 = vmax.f32 %v900_v6, %v864_v20  ;;  %v892_v6 = vadd.f32 %v1519_v46, %v1890_v31 }
 0x13c   :  { %1007 = vmatpush.msrb.mxu0 %v113_v60  ;;  %v902_v57 = vmax.f32 %v901_v35, %v868_v1 }
 0x13d   :  { %v2015_v59 = vpop.f32.mrf.mxu3 }
 0x13e   :  { %v2017_v40 = vpop.f32.mrf.mxu2  ;;  %v387_v29 = vpop.f32.mrf.mxu0  ;;  %1008 = vmatpush.msrb.mxu0 %v112_v36 }
 0x13f   :  { %v2020_v18 = vpop.f32.mrf.mxu1  ;;  %v872_v10 = vadd.f32 %v387_v29, %v1710_v51  ;;  %v777_v51 = vrot.slane %v1907_v23, 4  ;;  %v884_v29 = vadd.f32 %v1510_v41, %v1811_v42  ;;  %v855_v41 = vadd.f32 %v1978_v52, %v1592_v19 }
 0x140   :  { %1009 = vmatpush.msrb.mxu0 %v111_v58  ;;  %v863_v58 = vadd.f32 %v1997_v48, %v1666_v5  ;;  %v709_v19 = vadd.f32 %v1549_v61, %v1966_v50  ;;  %v717_v52 = vadd.f32 %v1612_v30, %v1984_v34  ;;  %v2074_v61 = vld [vmem:[%s2155_s1 + $0x260] ss:$8 sm:$0xf] }
 0x141   :  { %v903_v33 = vmax.f32 %v902_v57, %v872_v10  ;;  %v955_v31 = vmax.f32 %v1975_v63, %v855_v41  ;;  %v144_v57 = vld [vmem:[#allocation2 + $0x108] sm:$0xff] }
 0x142   :  { %1048 = vmatpush.msra.mxu2 %v144_v57  ;;  %v64_v50 = vld [vmem:[%s2155_s1 + $0x108] sm:$0xff] }
 0x143   :  { %v2212_v41 = vld [vmem:[#allocation8_spill] sm:$0xff]  ;;  %v2216_v57 = vld [vmem:[#allocation9_spill] sm:$0xff] }
 0x145   :  { %v2024_v17 = vpop.f32.mrf.mxu3 }
 0x146   :  { %v2026_v24 = vpop.f32.mrf.mxu2  ;;  %v390_v53 = vpop.f32.mrf.mxu0 }
 0x147   :  { %v2029_v32 = vpop.f32.mrf.mxu1  ;;  %v876_v14 = vadd.f32 %v390_v53, %v1748_v2  ;;  %v888_v2 = vadd.f32 %v1526_v49, %v1846_v62  ;;  %v778_v53 = vmax.f32 %v1907_v23, %v777_v51  ;;  %v859_v49 = vadd.f32 %v1991_v38, %v1900_v47  ;;  %v68_v51 = vld [vmem:[%s2155_s1 + $0x128] sm:$0xff] }
 0x148   :  { %v713_v62 = vadd.f32 %v1574_v7, %v1972_v44  ;;  %v867_v44 = vadd.f32 %v2007_v28, %v1675_v9  ;;  %v871_v9 = vadd.f32 %v2015_v59, %v1695_v39  ;;  %v858_v39 = vadd.f32 %v1999_v0, %v1934_v54 }
 0x149   :  { %v904_v12 = vmax.f32 %v903_v33, %v876_v14  ;;  %v779_v27 = vrot.slane %v778_v53, 2  ;;  %v160_v14 = vld [vmem:[#allocation2 + $0x188] sm:$0xff]  ;;  %v956_v7 = vmax.f32 %v955_v31, %v859_v49 }
 0x14a   :  { %v128_v33 = vld [vmem:[#allocation2 + $0x88] sm:$0xff]  ;;  %1068 = vmatpush.msrb.mxu3 %v160_v14  ;;  %v783_v5 = vmax.f32 %v709_v19, %v713_v62  ;;  %v866_v14 = vadd.f32 %v2017_v40, %v2216_v57 }
 0x14b   :  { %v780_v46 = vmax.f32 %v778_v53, %v779_v27  ;;  %1028 = vmatpush.msra.mxu1 %v128_v33  ;;  %v957_v34 = vmax.f32 %v956_v7, %v863_v58  ;;  %v978_v53 = vperm.slane %v2074_v61, 0  ;;  %v143_v58 = vld [vmem:[#allocation2 + $0x100] sm:$0xff] }
 0x14c   :  { %v784_v28 = vmax.f32 %v783_v5, %v717_v52  ;;  %1049 = vmatpush.msra.mxu2 %v143_v58  ;;  %v2217_v19 = vld [vmem:[#allocation28_spill] sm:$0xff] }
 0x14d   :  { %v2033_v43 = vpop.f32.mrf.mxu3  ;;  %v781_v30 = vrot.slane %v780_v46, 1  ;;  %v834_v52 = vrot.slane %v2217_v19, 4  ;;  %v2232_v58 = vld [vmem:[#allocation32_spill] sm:$0xff] }
 0x14e   :  { %v2035_v21 = vpop.f32.mrf.mxu2  ;;  %v393_v15 = vpop.f32.mrf.mxu0 }
 0x14f   :  { %v880_v16 = vadd.f32 %v393_v15, %v1776_v25  ;;  %v2038_v26 = vpop.f32.mrf.mxu1  ;;  %v782_v59 = vmax.f32 %v780_v46, %v781_v30 }
 0x151   :  { %v905_v20 = vmax.f32 %v904_v12, %v880_v16  ;;  %v854_v12 = vadd.f32 %v1993_v8, %v1631_v37  ;;  %v853_v16 = vadd.f32 %v1995_v22, %v64_v50  ;;  %v857_v37 = vadd.f32 %v2001_v11, %v68_v51  ;;  %v2214_v11 = vld [vmem:[#allocation10_spill] sm:$0xff] }
 0x152   :  { %v721_v22 = vadd.f32 %v1639_v45, %v64_v50  ;;  %v861_v62 = vadd.f32 %v2012_v13, %v2214_v11  ;;  %v2220_v50 = vld [vmem:[#allocation12_spill] sm:$0xff]  ;;  %v2230_v11 = vld [vmem:[#allocation21_spill] sm:$0xff] }
 0x153   :  { %v906_v60 = vmax.f32 %v905_v20, %v884_v29  ;;  %v159_v20 = vld [vmem:[#allocation2 + $0x180] sm:$0xff] }
 0x154   :  { %1069 = vmatpush.msrb.mxu3 %v159_v20 }
 0x155   :  { %v907_v1 = vmax.f32 %v906_v60, %v888_v2  ;;  %v696_v36 = vpop.f32.mrf.mxu3  ;;  %v958_v2 = vmax.f32 %v957_v34, %v867_v44  ;;  %v875_v60 = vadd.f32 %v2024_v17, %v1738_v55  ;;  %v936_v55 = vmax.f32 %v1987_v56, %v854_v12  ;;  %v2211_v17 = vld [vmem:[#allocation33_spill] sm:$0xff]  ;;  %v2219_v44 = vld [vmem:[#allocation19_spill] sm:$0xff] }
 0x156   :  { %v2048_v25 = vpop.f32.mrf.mxu2  ;;  %v917_v27 = vmax.f32 %v2211_v17, %v853_v16  ;;  %v870_v34 = vadd.f32 %v2026_v24, %v2220_v50  ;;  %v2221_v12 = vld [vmem:[#allocation13_spill] sm:$0xff]  ;;  %v835_v24 = vmax.f32 %v2217_v19, %v834_v52  ;;  %v2234_v52 = vld [vmem:[#allocation26_spill] sm:$0xff] }
 0x157   :  { %v908_v35 = vmax.f32 %v907_v1, %v892_v6  ;;  %v2050_v10 = vpop.f32.mrf.mxu1  ;;  %v725_v6 = vadd.f32 %v1661_v4, %v68_v51  ;;  %v959_v1 = vmax.f32 %v958_v2, %v871_v9  ;;  %v869_v40 = vadd.f32 %v2029_v32, %v2221_v12  ;;  %v2222_v51 = vld [vmem:[#allocation22_spill] sm:$0xff]  ;;  %v2226_v32 = vld [vmem:[#allocation17_spill] sm:$0xff] }
 0x158   :  { %v918_v56 = vmax.f32 %v917_v27, %v857_v37  ;;  %v2225_v37 = vld [vmem:[#allocation31_spill] sm:$0xff] }
 0x159   :  { %v909_v42 = vrot.slane %v908_v35, 4  ;;  %v960_v45 = vmax.f32 %v959_v1, %v875_v60 }
 0x15a   :  { %v919_v9 = vmax.f32 %v918_v56, %v861_v62 }
 0x15b   :  { %v910_v23 = vmax.f32 %v908_v35, %v909_v42  ;;  %v879_v35 = vadd.f32 %v2033_v43, %v1766_v3  ;;  %v2213_v42 = vld [vmem:[#allocation34_spill] sm:$0xff]  ;;  %v127_v3 = vld [vmem:[#allocation2 + $0x80] sm:$0xff]  ;;  %v937_v43 = vmax.f32 %v936_v55, %v858_v39 }
 0x15c   :  { %v862_v49 = vadd.f32 %v2213_v42, %v2212_v41  ;;  %1029 = vmatpush.msra.mxu1 %v127_v3 }
 0x15d   :  { %v911_v47 = vrot.slane %v910_v23, 2  ;;  %v699_v38 = vpop.f32.mrf.mxu3  ;;  %v961_v7 = vmax.f32 %v960_v45, %v879_v35 }
 0x15e   :  { %v2067_v63 = vpop.f32.mrf.mxu2  ;;  %v938_v30 = vmax.f32 %v937_v43, %v862_v49  ;;  %v2233_v43 = vld [vmem:[#allocation24_spill] sm:$0xff] }
 0x15f   :  { %v912_v48 = vmax.f32 %v910_v23, %v911_v47  ;;  %v2069_v15 = vpop.f32.mrf.mxu1  ;;  %v2215_v23 = vld [vmem:[#allocation16_spill] sm:$0xff]  ;;  %v2218_v47 = vld [vmem:[#allocation11_spill] sm:$0xff] }
 0x160   :  { %v883_v4 = vadd.f32 %v696_v36, %v2215_v23  ;;  %v865_v13 = vadd.f32 %v2020_v18, %v2218_v47  ;;  %v887_v36 = vadd.f32 %v699_v38, %v2219_v44  ;;  %v939_v2 = vmax.f32 %v938_v30, %v866_v14  ;;  %v2223_v18 = vld [vmem:[#allocation14_spill] sm:$0xff] }
 0x161   :  { %v913_v29 = vrot.slane %v912_v48, 1  ;;  %v874_v60 = vadd.f32 %v2035_v21, %v2223_v18  ;;  %v2228_v21 = vld [vmem:[#allocation25_spill] sm:$0xff]  ;;  %v881_v62 = vadd.f32 %v2069_v15, %v2230_v11 }
 0x162   :  { %v962_v16 = vmax.f32 %v961_v7, %v883_v4  ;;  %v920_v38 = vmax.f32 %v919_v9, %v865_v13  ;;  %v2231_v4 = vld [vmem:[#allocation23_spill] sm:$0xff]  ;;  %v2236_v9 = vld [vmem:[#allocation29_spill] sm:$0xff] }
 0x163   :  { %v914_v8 = vmax.f32 %v912_v48, %v913_v29  ;;  %v785_v48 = vmax.f32 %v784_v28, %v721_v22  ;;  %v878_v22 = vadd.f32 %v2048_v25, %v2226_v32  ;;  %v836_v25 = vrot.slane %v835_v24, 2  ;;  %v2235_v7 = vld [vmem:[#allocation27_spill] sm:$0xff] }
 0x164   :  { %v963_v39 = vmax.f32 %v962_v16, %v887_v36  ;;  %v921_v35 = vmax.f32 %v920_v38, %v869_v40 }
 0x165   :  { %v702_v54 = vpop.f32.mrf.mxu3  ;;  %v973_v0 = vsel %vm972_vm1, %v782_v59, %v914_v8  ;;  %v786_v20 = vmax.f32 %v785_v48, %v725_v6  ;;  %v940_v8 = vmax.f32 %v939_v2, %v870_v34  ;;  %v2227_v6 = vld [vmem:[#allocation18_spill] sm:$0xff]  ;;  %v837_v15 = vmax.f32 %v835_v24, %v836_v25 }
 0x166   :  { %v598_v46 = vpop.f32.mrf.mxu2  ;;  %v986_v31 = vadd.f32 %v978_v53, %v973_v0  ;;  %v891_v29 = vadd.f32 %v702_v54, %v2222_v51  ;;  %v2224_v53 = vld [vmem:[#allocation15_spill] sm:$0xff]  ;;  %v877_v55 = vadd.f32 %v2050_v10, %v2227_v6  ;;  %v815_v10 = vrot.slane %v2232_v58, 4  ;;  %v2237_v51 = vld [vmem:[#allocation30_spill] sm:$0xff] }
 0x167   :  { %v497_v33 = vpop.f32.mrf.mxu1  ;;  %v873_v28 = vadd.f32 %v2038_v26, %v2224_v53  ;;  %v795_v59 = vmax.f32 %v2225_v37, %v786_v20  ;;  %v941_v42 = vmax.f32 %v940_v8, %v874_v60  ;;  %v2229_v26 = vld [vmem:[#allocation20_spill] sm:$0xff]  ;;  %v838_v20 = vrot.slane %v837_v15, 1 }
 0x168   :  { %v990_v5 = vmax.f32 %v986_v31, 0.0  ;;  %v964_v17 = vmax.f32 %v963_v39, %v891_v29  ;;  %v882_v49 = vadd.f32 %v2067_v63, %v2229_v26  ;;  %v886_v31 = vadd.f32 %v598_v46, %v2231_v4 }
 0x169   :  { %v922_v0 = vmax.f32 %v921_v35, %v873_v28  ;;  %v942_v23 = vmax.f32 %v941_v42, %v878_v22  ;;  %v885_v56 = vadd.f32 %v497_v33, %v2233_v43  ;;  %v796_v14 = vrot.slane %v795_v59, 4 }
 0x16a   :  { %1010 = vmatmul.f32.vlgmr.msrb.gmra.mxu0 %v990_v5  ;;  %v816_v5 = vmax.f32 %v2232_v58, %v815_v10  ;;  %v981_v39 = vperm.slane %v2074_v61, 3 }
 0x16b   :  { %v923_v3 = vmax.f32 %v922_v0, %v877_v55  ;;  %v943_v19 = vmax.f32 %v942_v23, %v882_v49  ;;  %v797_v50 = vmax.f32 %v795_v59, %v796_v14  ;;  %v839_v59 = vmax.f32 %v837_v15, %v838_v20  ;;  %v188_v14 = vld [vmem:[#allocation2 + $0x268] sm:$0xff]  ;;  %v179_v15 = vld [vmem:[#allocation2 + $0x220] sm:$0xff] }
 0x16c   :  { %v817_v18 = vrot.slane %v816_v5, 2  ;;  %v980_v0 = vperm.slane %v2074_v61, 2 }
 0x16d   :  { %v705_v1 = vpop.f32.mrf.mxu3  ;;  %v924_v47 = vmax.f32 %v923_v3, %v881_v62  ;;  %v944_v36 = vmax.f32 %v943_v19, %v886_v31  ;;  %v798_v53 = vrot.slane %v797_v50, 2  ;;  %v187_v19 = vld [vmem:[#allocation2 + $0x260] sm:$0xff] }
 0x16e   :  { %v895_v27 = vadd.f32 %v705_v1, %v2228_v21  ;;  %v601_v41 = vpop.f32.mrf.mxu2  ;;  %v818_v32 = vmax.f32 %v816_v5, %v817_v18  ;;  %v177_v5 = vld [vmem:[#allocation2 + $0x210] sm:$0xff] }
 0x16f   :  { %v500_v54 = vpop.f32.mrf.mxu1  ;;  %v890_v63 = vadd.f32 %v601_v41, %v2234_v52  ;;  %v925_v48 = vmax.f32 %v924_v47, %v885_v56  ;;  %v799_v35 = vmax.f32 %v797_v50, %v798_v53  ;;  %v190_v56 = vld [vmem:[#allocation2 + $0x278] sm:$0xff]  ;;  %v185_v52 = vld [vmem:[#allocation2 + $0x250] sm:$0xff]  ;;  %v183_v47 = vld [vmem:[#allocation2 + $0x240] sm:$0xff] }
 0x170   :  { %v965_v45 = vmax.f32 %v964_v17, %v895_v27  ;;  %v889_v44 = vadd.f32 %v500_v54, %v2235_v7  ;;  %v819_v41 = vrot.slane %v818_v32, 1  ;;  %1074 = vmatpush.msra.mxu0 %v190_v56  ;;  %v181_v7 = vld [vmem:[#allocation2 + $0x230] sm:$0xff] }
 0x171   :  { %v945_v34 = vmax.f32 %v944_v36, %v890_v63  ;;  %v800_v26 = vrot.slane %v799_v35, 1  ;;  %v184_v63 = vld [vmem:[#allocation2 + $0x248] sm:$0xff]  ;;  %v178_v36 = vld [vmem:[#allocation2 + $0x218] sm:$0xff] }
 0x172   :  { %v966_v57 = vrot.slane %v965_v45, 4  ;;  %v926_v16 = vmax.f32 %v925_v48, %v889_v44  ;;  %v820_v62 = vmax.f32 %v818_v32, %v819_v41  ;;  %v180_v44 = vld [vmem:[#allocation2 + $0x228] sm:$0xff] }
 0x173   :  { %v801_v23 = vmax.f32 %v799_v35, %v800_v26  ;;  %v176_v48 = vld [vmem:[#allocation2 + $0x208] sm:$0xff] }
 0x174   :  { %v967_v13 = vmax.f32 %v965_v45, %v966_v57  ;;  %v979_v45 = vperm.slane %v2074_v61, 1  ;;  %v189_v57 = vld [vmem:[#allocation2 + $0x270] sm:$0xff]  ;;  %v186_v61 = vld [vmem:[#allocation2 + $0x258] sm:$0xff] }
 0x175   :  { %1075 = vmatpush.msra.mxu0 %v189_v57 }
 0x176   :  { %v968_v46 = vrot.slane %v967_v13, 2  ;;  %v604_v30 = vpop.f32.mrf.mxu2 }
 0x177   :  { %v894_v33 = vadd.f32 %v604_v30, %v2236_v9  ;;  %v503_v12 = vpop.f32.mrf.mxu1  ;;  %1076 = vmatpush.msra.mxu0 %v188_v14  ;;  %v109_v30 = vld [vmem:[%s2155_s1 + $0x261] ss:$0 sm:$0xff] }
 0x178   :  { %v969_v40 = vmax.f32 %v967_v13, %v968_v46  ;;  %v893_v29 = vadd.f32 %v503_v12, %v2237_v51  ;;  %v182_v13 = vld [vmem:[#allocation2 + $0x238] sm:$0xff]  ;;  %v175_v46 = vld [vmem:[#allocation2 + $0x200] sm:$0xff] }
 0x179   :  { %v946_v2 = vmax.f32 %v945_v34, %v894_v33  ;;  %1077 = vmatpush.msra.mxu0 %v187_v19 }
 0x17a   :  { %v970_v60 = vrot.slane %v969_v40, 1  ;;  %v927_v38 = vmax.f32 %v926_v16, %v893_v29  ;;  %v110_v29 = vld [vmem:[%s2155_s1 + $0x262] ss:$0 sm:$0xff] }
 0x17b   :  { %v947_v28 = vrot.slane %v946_v2, 4  ;;  %1078 = vmatpush.msra.mxu0 %v186_v61 }
 0x17c   :  { %v971_v24 = vmax.f32 %v969_v40, %v970_v60  ;;  %v928_v37 = vrot.slane %v927_v38, 4 }
 0x17d   :  { %v948_v8 = vmax.f32 %v946_v2, %v947_v28  ;;  %1079 = vmatpush.msra.mxu0 %v185_v52 }
 0x17e   :  { %v929_v22 = vmax.f32 %v927_v38, %v928_v37  ;;  %v976_v1 = vsel %vm972_vm1, %v839_v59, %v971_v24 }
 0x17f   :  { %v949_v6 = vrot.slane %v948_v8, 2  ;;  %v989_v55 = vadd.f32 %v981_v39, %v976_v1  ;;  %1080 = vmatpush.msra.mxu0 %v184_v63 }
 0x180   :  { %v930_v17 = vrot.slane %v929_v22, 2 }
 0x181   :  { %v950_v21 = vmax.f32 %v948_v8, %v949_v6  ;;  %v993_v27 = vmax.f32 %v989_v55, 0.0  ;;  %1081 = vmatpush.msra.mxu0 %v183_v47 }
 0x182   :  { %v931_v42 = vmax.f32 %v929_v22, %v930_v17 }
 0x183   :  { %v951_v49 = vrot.slane %v950_v21, 1  ;;  %1070 = vmatmul.f32.vlgmr.msrb.gmra.mxu3 %v993_v27  ;;  %1082 = vmatpush.msra.mxu0 %v182_v13 }
 0x184   :  { %v932_v54 = vrot.slane %v931_v42, 1 }
 0x185   :  { %v952_v11 = vmax.f32 %v950_v21, %v951_v49  ;;  %1083 = vmatpush.msra.mxu0 %v181_v7 }
 0x186   :  { %v933_v25 = vmax.f32 %v931_v42, %v932_v54 }
 0x187   :  { %v975_v4 = vsel %vm972_vm1, %v820_v62, %v952_v11  ;;  %1084 = vmatpush.msra.mxu0 %v180_v44 }
 0x188   :  { %v988_v31 = vadd.f32 %v980_v0, %v975_v4  ;;  %v974_v58 = vsel %vm972_vm1, %v801_v23, %v933_v25 }
 0x189   :  { %v987_v10 = vadd.f32 %v979_v45, %v974_v58  ;;  %1085 = vmatpush.msra.mxu0 %v179_v15 }
 0x18a   :  { %v992_v3 = vmax.f32 %v988_v31, 0.0 }
 0x18b   :  { %v991_v43 = vmax.f32 %v987_v10, 0.0  ;;  %1086 = vmatpush.msra.mxu0 %v178_v36 }
 0x18c   :  { %1050 = vmatmul.f32.vlgmr.msra.gmra.mxu2 %v992_v3 }
 0x18d   :  { %1030 = vmatmul.f32.vlgmr.msra.gmra.mxu1 %v991_v43  ;;  %1087 = vmatpush.msra.mxu0 %v177_v5 }
 0x18f   :  { %1088 = vmatpush.msra.mxu0 %v176_v48 }
 0x191   :  { %1089 = vmatpush.msra.mxu0 %v175_v46 }
 0x1e7   :  { %v1011_v50 = vpop.f32.mrf.mxu0 }
 0x1e8   :  { %v1012_v9 = vadd.f32 %v1011_v50, %v109_v30 }
 0x206   :  { %v1071_v16 = vpop.f32.mrf.mxu3 }
 0x20a   :  { %v1031_v34 = vpop.f32.mrf.mxu1 }
 0x20b   :  { %v1032_v33 = vadd.f32 %v1031_v34, %v1012_v9 }
 0x20f   :  { %v1051_v12 = vpop.f32.mrf.mxu2 }
 0x210   :  { %v1052_v40 = vadd.f32 %v1051_v12, %v1032_v33 }
 0x212   :  { %v1072_v51 = vadd.f32 %v1071_v16, %v1052_v40 }
 0x214   :  { %1090 = vmatmul.f32.vlgmr.msra.gmra.mxu0 %v1072_v51 }
 0x291   :  { %v1091_v20 = vpop.f32.mrf.mxu0 }
 0x292   :  { %v1092_v2 = vadd.f32 %v1091_v20, %v110_v29 }
 0x294   :  { %1094 = vst [vmem:[#allocation5] sm:$0x3] %v1092_v2 }
 0x295   :  { %1105 = dma.vmem_to_hbm [thread:$0]  %s1101_s7, 32, %s1103_s10, [#allocation4]  }
 0x296   :  { %1289 = dma.done.wait [#allocation4], 32  }
 0x297   :  { %1290 = vsyncadd [#allocation4], 4294967264 }
 0x298   :  { %1110 = vsyncpa [#allocation3], 1 }
 0x299   :  { %1111 = vsyncpa [#allocation4], 1 }

</bundles_post_ra>
